<compile_context>
chip_gen: v6e
topology: v6e:2x2x1
jax: 0.10.0
libtpu: 0.0.40
codegen_flags: <defaults>
</compile_context>

<pallas_src>
import jax
import jax.numpy as jnp
import numpy as np
from jax.experimental import pallas as pl
from jax.experimental.pallas import tpu as pltpu

IN_GAME = 3 * 3 + 1            # 10
IN_MEM = 13
IN_FEATURES = IN_GAME + IN_MEM  # 23
HIDDEN = 20
OUT_FEATURES = 3

LANES = 128
BIAS_LANE_X = IN_FEATURES      # lane 23 of x carries 1.0 (layer-1 bias)
BIAS_LANE_H = HIDDEN           # lane 20 of h1/h2 carries 1.0 (layer-2/3 bias)
MAX_BLOCK_B = 256              # batch tile (M) — keeps the v6e/v7x MXU fed


def _round_up(n, m):
    return ((n + m - 1) // m) * m


def gamenet_kernel(x_ref, p_ref, o_ref):
    # x_ref : (TB, 128) f32  rows = samples; lanes 0..22 = [input, mem_state],
    #                        lane 23 = 1.0, rest 0.
    # p_ref : (3, 128, 128) f32 packed parameter slab (see pack_params);
    #                        resident in VMEM across all grid steps.
    # o_ref : (TB, 128) f32  lanes 0..2 = tanh output, rest = tanh(0) = 0.
    x = x_ref[...]
    hp = jax.lax.Precision.HIGHEST

    # Layer 1: (TB,128) @ (128,128); cols 0..19 = L1 out, col 20 = carried 1.0.
    h1 = jnp.maximum(
        jnp.dot(x, p_ref[0], preferred_element_type=jnp.float32, precision=hp),
        0.0)
    # Layer 2: cols 0..19 = L2 out, col 20 = carried 1.0.
    h2 = jnp.maximum(
        jnp.dot(h1, p_ref[1], preferred_element_type=jnp.float32, precision=hp),
        0.0)
    # Layer 3 + Tanh: cols 0..2 = output, rest tanh(0) = 0.
    o_ref[...] = jnp.tanh(
        jnp.dot(h2, p_ref[2], preferred_element_type=jnp.float32, precision=hp))


def init_params(key):
    """Torch-layout params with nn.Linear default init U(-1/sqrt(fan_in), ...)."""
    def linear(k, fan_in, fan_out):
        kw, kb = jax.random.split(k)
        bound = 1.0 / np.sqrt(fan_in)
        w = jax.random.uniform(kw, (fan_out, fan_in), jnp.float32, -bound, bound)
        b = jax.random.uniform(kb, (fan_out,), jnp.float32, -bound, bound)
        return w, b

    k1, k2, k3 = jax.random.split(key, 3)
    w1, b1 = linear(k1, IN_FEATURES, HIDDEN)
    w2, b2 = linear(k2, HIDDEN, HIDDEN)
    w3, b3 = linear(k3, HIDDEN, OUT_FEATURES)
    return w1, b1, w2, b2, w3, b3


def pack_params(w1, b1, w2, b2, w3, b3):
    """Pack all 6 tensors into one (3, 128, 128) f32 slab (single DMA).

    slab[0]: rows 0..22 = W1^T, row 23 = b1 (cols 0..19); [23,20] = 1.0 so the
             bias-one in x lane 23 propagates to h1 lane 20 (relu(1)=1).
    slab[1]: rows 0..19 = W2^T, row 20 = b2 (cols 0..19); [20,20] = 1.0 so the
             bias-one propagates to h2 lane 20.
    slab[2]: rows 0..19 = W3^T, row 20 = b3 (cols 0..2).
    All other entries are zero, so padded lanes stay exactly zero.
    """
    p = np.zeros((3, LANES, LANES), np.float32)
    p[0, :IN_FEATURES, :HIDDEN] = np.asarray(w1).T
    p[0, BIAS_LANE_X, :HIDDEN] = np.asarray(b1)
    p[0, BIAS_LANE_X, BIAS_LANE_H] = 1.0
    p[1, :HIDDEN, :HIDDEN] = np.asarray(w2).T
    p[1, BIAS_LANE_H, :HIDDEN] = np.asarray(b2)
    p[1, BIAS_LANE_H, BIAS_LANE_H] = 1.0
    p[2, :HIDDEN, :OUT_FEATURES] = np.asarray(w3).T
    p[2, BIAS_LANE_H, :OUT_FEATURES] = np.asarray(b3)
    return jnp.asarray(p)


def gamenet_forward_batch(inp, mem_state, packed_params, *, block_b=None):
    """Batched forward: inp (B, 10), mem_state (B, 13) -> (B, 3)."""
    B = inp.shape[0]
    if block_b is None:
        block_b = min(MAX_BLOCK_B, _round_up(B, 8))     # sublane-aligned tile
    b_pad = _round_up(B, block_b)

    # Build the lane-dense augmented feature block once per batch (fused XLA op).
    x = jnp.zeros((b_pad, LANES), jnp.float32)
    x = x.at[:B, :IN_GAME].set(inp.astype(jnp.float32))
    x = x.at[:B, IN_GAME:IN_FEATURES].set(mem_state.astype(jnp.float32))
    x = x.at[:, BIAS_LANE_X].set(1.0)

    grid = (b_pad // block_b,)
    out = pl.pallas_call(
        gamenet_kernel,
        out_shape=jax.ShapeDtypeStruct((b_pad, LANES), jnp.float32),
        grid=grid,
        in_specs=[
            pl.BlockSpec((block_b, LANES), lambda i: (i, 0)),
            # Constant block index -> param slab DMA'd once, resident across steps.
            pl.BlockSpec((3, LANES, LANES), lambda i: (0, 0, 0)),
        ],
        out_specs=pl.BlockSpec((block_b, LANES), lambda i: (i, 0)),
        compiler_params=pltpu.CompilerParams(
            dimension_semantics=("parallel",)),   # shards batch tiles across v7x TCs
    )(x, packed_params)
    return out[:B, :OUT_FEATURES]


def gamenet_forward(inp, mem_state, packed_params):
    """Single-sample forward matching the torch module: (10,), (13,) -> (3,)."""
    return gamenet_forward_batch(inp[None, :], mem_state[None, :], packed_params)[0]


def gamenet_reference(inp, mem_state, w1, b1, w2, b2, w3, b3):
    """Pure-JAX reference (works for 1-D or batched inputs)."""
    hp = jax.lax.Precision.HIGHEST
    x = jnp.concatenate([inp, mem_state], axis=-1).astype(jnp.float32)
    h = jnp.maximum(jnp.matmul(x, w1.T, precision=hp) + b1, 0.0)
    h = jnp.maximum(jnp.matmul(h, w2.T, precision=hp) + b2, 0.0)
    return jnp.tanh(jnp.matmul(h, w3.T, precision=hp) + b3)


if __name__ == "__main__":
    key = jax.random.PRNGKey(0)
    kp, ki, km = jax.random.split(key, 3)

    w1, b1, w2, b2, w3, b3 = init_params(kp)
    packed = pack_params(w1, b1, w2, b2, w3, b3)

    # Batched throughput path: 8 independent game states per call.
    B = 8
    inp_b = jax.random.normal(ki, (B, IN_GAME), jnp.float32)     # (8, 10)
    mem_b = jax.random.normal(km, (B, IN_MEM), jnp.float32)      # (8, 13)

    out_b = jax.block_until_ready(gamenet_forward_batch(inp_b, mem_b, packed))
    ref_b = gamenet_reference(inp_b, mem_b, w1, b1, w2, b2, w3, b3)
    assert out_b.shape == (B, OUT_FEATURES)
    assert np.allclose(np.asarray(out_b), np.asarray(ref_b), atol=1e-4, rtol=1e-4)

    # Single-sample path — the torch module's exact forward(input, mem_state).
    out1 = jax.block_until_ready(gamenet_forward(inp_b[0], mem_b[0], packed))
    ref1 = gamenet_reference(inp_b[0], mem_b[0], w1, b1, w2, b2, w3, b3)
    assert out1.shape == (OUT_FEATURES,)
    assert np.allclose(np.asarray(out1), np.asarray(ref1), atol=1e-4, rtol=1e-4)

    print("KERNEL_OK")
</pallas_src>

<mosaic_0001>
module attributes {stable_mosaic.version = 11 : i64} {
  func.func @gamenet_kernel(%arg0: i32, %arg1: memref<8x128xf32, #tpu.memory_space<vmem>>, %arg2: memref<3x128x128xf32, #tpu.memory_space<vmem>>, %arg3: memref<8x128xf32, #tpu.memory_space<vmem>>) attributes {dimension_semantics = [#tpu.dimension_semantics<parallel>], iteration_bounds = array<i64: 1>, scalar_prefetch = 0 : i64, scratch_operands = 0 : i64, tpu.core_type = #tpu.core_type<tc>, window_params = [{transform_indices = @transform_0, window_bounds = array<i64: 8, 128>}, {pipeline_mode = #tpu.pipeline_mode<synchronous>, transform_indices = @transform_1, window_bounds = array<i64: 3, 128, 128>}, {transform_indices = @transform_2, window_bounds = array<i64: 8, 128>}]} {
    %c0 = arith.constant 0 : index
    %c0_0 = arith.constant 0 : index
    %0 = vector.load %arg1[%c0, %c0_0] : memref<8x128xf32, #tpu.memory_space<vmem>>, vector<8x128xf32>
    %c0_1 = arith.constant 0 : index
    %c0_2 = arith.constant 0 : index
    %c0_3 = arith.constant 0 : index
    %1 = vector.load %arg2[%c0_1, %c0_2, %c0_3] : memref<3x128x128xf32, #tpu.memory_space<vmem>>, vector<1x128x128xf32>
    %2 = vector.shape_cast %1 : vector<1x128x128xf32> to vector<128x128xf32>
    %cst = arith.constant dense<0.000000e+00> : vector<8x128xf32>
    %3 = tpu.matmul %0, %2, %cst {dimension_numbers = #tpu.dot_dimension_numbers<[1], [0], [0], [1], [0, 0, 1, 1], [], []>, precision = #tpu.contract_precision<fp32>} : vector<8x128xf32>, vector<128x128xf32>, vector<8x128xf32> -> vector<8x128xf32>
    %cst_4 = arith.constant 0.000000e+00 : f32
    %4 = vector.broadcast %cst_4 : f32 to vector<8x128xf32>
    %5 = arith.maximumf %3, %4 : vector<8x128xf32>
    %c1 = arith.constant 1 : index
    %c0_5 = arith.constant 0 : index
    %c0_6 = arith.constant 0 : index
    %6 = vector.load %arg2[%c1, %c0_5, %c0_6] : memref<3x128x128xf32, #tpu.memory_space<vmem>>, vector<1x128x128xf32>
    %7 = vector.shape_cast %6 : vector<1x128x128xf32> to vector<128x128xf32>
    %cst_7 = arith.constant dense<0.000000e+00> : vector<8x128xf32>
    %8 = tpu.matmul %5, %7, %cst_7 {dimension_numbers = #tpu.dot_dimension_numbers<[1], [0], [0], [1], [0, 0, 1, 1], [], []>, precision = #tpu.contract_precision<fp32>} : vector<8x128xf32>, vector<128x128xf32>, vector<8x128xf32> -> vector<8x128xf32>
    %cst_8 = arith.constant 0.000000e+00 : f32
    %9 = vector.broadcast %cst_8 : f32 to vector<8x128xf32>
    %10 = arith.maximumf %8, %9 : vector<8x128xf32>
    %c2 = arith.constant 2 : index
    %c0_9 = arith.constant 0 : index
    %c0_10 = arith.constant 0 : index
    %11 = vector.load %arg2[%c2, %c0_9, %c0_10] : memref<3x128x128xf32, #tpu.memory_space<vmem>>, vector<1x128x128xf32>
    %12 = vector.shape_cast %11 : vector<1x128x128xf32> to vector<128x128xf32>
    %cst_11 = arith.constant dense<0.000000e+00> : vector<8x128xf32>
    %13 = tpu.matmul %10, %12, %cst_11 {dimension_numbers = #tpu.dot_dimension_numbers<[1], [0], [0], [1], [0, 0, 1, 1], [], []>, precision = #tpu.contract_precision<fp32>} : vector<8x128xf32>, vector<128x128xf32>, vector<8x128xf32> -> vector<8x128xf32>
    %14 = math.tanh %13 : vector<8x128xf32>
    %c0_12 = arith.constant 0 : index
    %c0_13 = arith.constant 0 : index
    %15 = vector.load %arg3[%c0_12, %c0_13] : memref<8x128xf32, #tpu.memory_space<vmem>>, vector<8x128xf32>
    tpu.vector_store %arg3[%c0_12, %c0_13], %14 {strides = array<i32>} : memref<8x128xf32, #tpu.memory_space<vmem>>, vector<8x128xf32>,
    return
  }
  func.func @transform_0(%arg0: i32) -> (i32, i32) {
    %c0_i32 = arith.constant 0 : i32
    %c0_i32_0 = arith.constant 0 : i32
    return %arg0, %c0_i32 : i32, i32
  }
  func.func @transform_1(%arg0: i32) -> (i32, i32, i32) {
    %c0_i32 = arith.constant 0 : i32
    %c0_i32_0 = arith.constant 0 : i32
    %c0_i32_1 = arith.constant 0 : i32
    %c0_i32_2 = arith.constant 0 : i32
    return %c0_i32, %c0_i32_0, %c0_i32_1 : i32, i32, i32
  }
  func.func @transform_2(%arg0: i32) -> (i32, i32) {
    %c0_i32 = arith.constant 0 : i32
    %c0_i32_0 = arith.constant 0 : i32
    return %arg0, %c0_i32 : i32, i32
  }
}

</mosaic_0001>

<bundles_post_ra>
// kernel: tpu_custom_call.1
= control target key start
LH: loop header
LB: loop body
LE: loop exit
PB: predicated region body
PF: predicated region fallthrough
CT: control target
= control target key end

     0   :  { %7 = vsyncpa [#allocation3], 0  ;;  %s4155_s0 = inlined_call_operand.hbm [shape: f32[8,128], index: 0, kind: input, shape index: {}]   ;;  %s4156_s1 = inlined_call_operand.hbm [shape: f32[3,128,128], index: 1, kind: input, shape index: {}]   ;;  %s4157_s2 = inlined_call_operand.hbm [shape: f32[8,128], index: 2, kind: output, shape index: {}]  }
   0x1   :  { %8 = vsyncpa [#allocation6], 0 }
   0x2   :  { %9 = vsyncpa [#allocation4], 0  ;;  %s3043_s9 = smov [#allocation2]   ;;  %s3044_s11 = smov [#allocation5]  }
   0x3   :  { %s16_s10 = sshll.u32 %s3043_s9, 4  ;;  %s25_s12 = sshll.u32 %s3044_s11, 4  ;;  %s17_s10 = int_to_ptr.vmem [resolvable:$true] %s16_s10  ;;  %s26_s12 = int_to_ptr.vmem [resolvable:$true] %s25_s12 }
   0x4   :  { %s2985_s13 = scalar_lea.vmem %s17_s10, 128  ;;  %p2990_p1 = scmp.lt.s32.totalorder %s17_s10, %s17_s10 }
   0x5   :  { %p2986_p0 = scmp.ne.s32.totalorder %s17_s10, %s2985_s13  ;;  %p2991_p2 = scmp.lt.s32.totalorder %s2985_s13, %s2985_s13 }
   0x7   :  { %p2992_p3 = por %p2991_p2, %p2990_p1 }
   0x9   :  { %p2993_p4 = pnand %p2992_p3, %p2986_p0 }
   0xb   :  { %2996 = shalt.err (!%p2993_p4)
}
   0xc   :  { %19 = dma.hbm_to_vmem [thread:$0]  %s4155_s0, 128, %s17_s10, [#allocation3]  }
   0xd   :  { %s3005_s16 = scalar_lea.vmem %s26_s12, 6144  ;;  %p3010_p6 = scmp.lt.s32.totalorder %s26_s12, %s26_s12 }
   0xe   :  { %p3006_p5 = scmp.ne.s32.totalorder %s26_s12, %s3005_s16  ;;  %p3011_p7 = scmp.lt.s32.totalorder %s3005_s16, %s3005_s16 }
  0x10   :  { %p3012_p8 = por %p3011_p7, %p3010_p6 }
  0x12   :  { %p3013_p9 = pnand %p3012_p8, %p3006_p5 }
  0x14   :  { %3016 = shalt.err (!%p3013_p9)
}
  0x15   :  { %s3045_s17 = smov 128   ;;  %s3046_s18 = smov 8  }
  0x16   :  { %31 = dma.hbm_to_vmem [thread:$0]  %s4156_s1, 6144, %s26_s12, [#allocation6], %s3045_s17, %s3045_s17, %s3046_s18  }
  0x17   :  { %3037 = dma.done.wait [#allocation3], 128  }
  0x18   :  { %3038 = vsyncadd [#allocation3], 4294967168 }
  0x19   :  { %3039 = dma.done.wait [#allocation6], 6144  }
  0x1a   :  { %3040 = vsyncadd [#allocation6], 4294961152  ;;  %v3047_v0 = vmov 0.0   ;;  %vm3048_vm0 = vmmov 0   ;;  %v54_v1 = vld [vmem:[#allocation5 + $0x78] sm:$0xff]  ;;  %v53_v2 = vld [vmem:[#allocation5 + $0x70] sm:$0xff] }
  0x1b   :  { %2338 = vmatprep.subr.mxu0 %v3047_v0  ;;  %2373 = vmatprep.subr.mxu1 %v3047_v0  ;;  %v52_v3 = vld [vmem:[#allocation5 + $0x68] sm:$0xff]  ;;  %v3077_v4 = vand.u32 4294901760, %v54_v1  ;;  %v3079_v5 = vand.u32 4294901760, %v53_v2  ;;  %v51_v7 = vld [vmem:[#allocation5 + $0x60] sm:$0xff]  ;;  %v50_v8 = vld [vmem:[#allocation5 + $0x58] sm:$0xff]  ;;  %s3049_s0 = smov [#allocation7]  }
  0x1c   :  { %2370 = vmatprep.mubr.msk.f32.mxu0 %vm3048_vm0, %v3047_v0  ;;  %2405 = vmatprep.mubr.msk.f32.mxu1 %vm3048_vm0, %v3047_v0  ;;  %v3081_v6 = vand.u32 4294901760, %v52_v3  ;;  %v49_v9 = vld [vmem:[#allocation5 + $0x50] sm:$0xff]  ;;  %v3083_v10 = vand.u32 4294901760, %v51_v7  ;;  %v3085_v11 = vand.u32 4294901760, %v50_v8  ;;  %v48_v13 = vld [vmem:[#allocation5 + $0x48] sm:$0xff]  ;;  %v47_v14 = vld [vmem:[#allocation5 + $0x40] sm:$0xff] }
  0x1d   :  { %v3087_v12 = vand.u32 4294901760, %v49_v9  ;;  %2339 = vmatpush3.msra.mxu0 %v3077_v4  ;;  %v3091_v15 = vsub.f32 %v54_v1, %v3077_v4  ;;  %v3094_v16 = vsub.f32 %v53_v2, %v3079_v5  ;;  %v3096_v17 = vand.u32 4294901760, %v48_v13  ;;  %v46_v19 = vld [vmem:[#allocation5 + $0x38] sm:$0xff]  ;;  %v45_v26 = vld [vmem:[#allocation5 + $0x30] sm:$0xff]  ;;  %v44_v36 = vld [vmem:[#allocation5 + $0x28] sm:$0xff]  ;;  %s2022_s1 = sshll.u32 %s3049_s0, 4  ;;  %s2023_s1 = int_to_ptr.vmem [resolvable:$true] %s2022_s1 }
  0x1e   :  { %v3099_v18 = vsub.f32 %v52_v3, %v3081_v6  ;;  %2340 = vmatprep.subr.mxu0 %v3047_v0  ;;  %v3103_v20 = vsub.f32 %v51_v7, %v3083_v10  ;;  %v3106_v21 = vsub.f32 %v50_v8, %v3085_v11  ;;  %v3112_v25 = vand.u32 4294901760, %v47_v14  ;;  %v43_v41 = vld [vmem:[#allocation5 + $0x20] sm:$0xff]  ;;  %v42_v49 = vld [vmem:[#allocation5 + $0x18] sm:$0xff]  ;;  %v41_v54 = vld [vmem:[#allocation5 + $0x10] sm:$0xff]  ;;  %s3017_s21 = scalar_lea.vmem %s2023_s1, 128  ;;  %p3022_p11 = scmp.lt.s32.totalorder %s2023_s1, %s2023_s1 }
  0x1f   :  { %2341 = vmatpush3.msra.mxu0 %v3079_v5  ;;  %v149_v22 = vand.u32 4294901760, %v3091_v15  ;;  %v156_v23 = vand.u32 4294901760, %v3094_v16  ;;  %v3116_v28 = vand.u32 4294901760, %v46_v19  ;;  %v3120_v30 = vsub.f32 %v49_v9, %v3087_v12  ;;  %v38_v50 = vld [vmem:[#allocation2] sm:$0xff]  ;;  %v40_v60 = vld [vmem:[#allocation5 + $0x8] sm:$0xff]  ;;  %v39_v7 = vld [vmem:[#allocation5] sm:$0xff]  ;;  %p3018_p10 = scmp.ne.s32.totalorder %s2023_s1, %s3017_s21  ;;  %p3023_p12 = scmp.lt.s32.totalorder %s3017_s21, %s3017_s21 }
  0x20   :  { %v163_v24 = vand.u32 4294901760, %v3099_v18  ;;  %2342 = vmatprep.subr.mxu0 %v3047_v0  ;;  %v170_v27 = vand.u32 4294901760, %v3103_v20  ;;  %v177_v29 = vand.u32 4294901760, %v3106_v21  ;;  %v3133_v34 = vsub.f32 %v48_v13, %v3096_v17 }
  0x21   :  { %2343 = vmatpush3.msra.mxu0 %v3081_v6  ;;  %v150_v31 = vsub.f32 %v3091_v15, %v149_v22  ;;  %v157_v32 = vsub.f32 %v3094_v16, %v156_v23  ;;  %v3136_v35 = vand.u32 4294901760, %v45_v26  ;;  %v184_v40 = vand.u32 4294901760, %v3120_v30  ;;  %p3024_p13 = por %p3023_p12, %p3022_p11 }
  0x22   :  { %v164_v33 = vsub.f32 %v3099_v18, %v163_v24  ;;  %2344 = vmatprep.subr.mxu0 %v3047_v0  ;;  %v171_v39 = vsub.f32 %v3103_v20, %v170_v27  ;;  %v178_v42 = vsub.f32 %v3106_v21, %v177_v29  ;;  %v3148_v43 = vsub.f32 %v47_v14, %v3112_v25 }
  0x23   :  { %2345 = vmatpush3.msra.mxu0 %v3083_v10  ;;  %v151_v37 = vand.u32 4294901760, %v150_v31  ;;  %v158_v38 = vand.u32 4294901760, %v157_v32  ;;  %v3151_v45 = vand.u32 4294901760, %v44_v36  ;;  %v191_v46 = vand.u32 4294901760, %v3133_v34  ;;  %p3025_p0 = pnand %p3024_p13, %p3018_p10 }
  0x24   :  { %2346 = vmatprep.subr.mxu0 %v3047_v0  ;;  %v165_v44 = vand.u32 4294901760, %v164_v33  ;;  %v3155_v47 = vsub.f32 %v46_v19, %v3116_v28  ;;  %v3159_v48 = vand.u32 4294901760, %v43_v41  ;;  %v172_v51 = vand.u32 4294901760, %v171_v39 }
  0x25   :  { %2347 = vmatpush3.msra.mxu0 %v3085_v11  ;;  %2374 = vmatpush3.msra.mxu1 %v151_v37  ;;  %v185_v52 = vsub.f32 %v3120_v30, %v184_v40  ;;  %v198_v53 = vand.u32 4294901760, %v3148_v43  ;;  %v3167_v55 = vsub.f32 %v45_v26, %v3136_v35  ;;  %v179_v56 = vand.u32 4294901760, %v178_v42 }
  0x26   :  { %2348 = vmatprep.subr.mxu0 %v3047_v0  ;;  %2375 = vmatprep.subr.mxu1 %v3047_v0  ;;  %v205_v57 = vand.u32 4294901760, %v3155_v47  ;;  %v192_v58 = vsub.f32 %v3133_v34, %v191_v46  ;;  %v3176_v59 = vand.u32 4294901760, %v42_v49  ;;  %v3179_v61 = vsub.f32 %v44_v36, %v3151_v45 }
  0x27   :  { %2349 = vmatpush3.msra.mxu0 %v3087_v12  ;;  %2376 = vmatpush3.msra.mxu1 %v158_v38  ;;  %v3181_v62 = vand.u32 4294901760, %v38_v50  ;;  %v3185_v63 = vand.u32 4294901760, %v41_v54  ;;  %v186_v1 = vand.u32 4294901760, %v185_v52  ;;  %v199_v2 = vsub.f32 %v3148_v43, %v198_v53 }
  0x28   :  { %2350 = vmatprep.subr.mxu0 %v3047_v0  ;;  %2377 = vmatprep.subr.mxu1 %v3047_v0  ;;  %v212_v3 = vand.u32 4294901760, %v3167_v55  ;;  %v3193_v8 = vsub.f32 %v43_v41, %v3159_v48  ;;  %v206_v9 = vsub.f32 %v3155_v47, %v205_v57  ;;  %v3200_v13 = vand.u32 4294901760, %v40_v60 }
  0x29   :  { %2351 = vmatpush3.msra.mxu0 %v3096_v17  ;;  %2378 = vmatpush3.msra.mxu1 %v165_v44  ;;  %v193_v14 = vand.u32 4294901760, %v192_v58  ;;  %v219_v19 = vand.u32 4294901760, %v3179_v61  ;;  %v3205_v26 = vsub.f32 %v38_v50, %v3181_v62  ;;  %v3208_v31 = vsub.f32 %v42_v49, %v3176_v59 }
  0x2a   :  { %2352 = vmatprep.subr.mxu0 %v3047_v0  ;;  %2379 = vmatprep.subr.mxu1 %v3047_v0  ;;  %v3212_v32 = vand.u32 4294901760, %v39_v7  ;;  %v200_v33 = vand.u32 4294901760, %v199_v2  ;;  %v213_v36 = vsub.f32 %v3167_v55, %v212_v3  ;;  %v226_v37 = vand.u32 4294901760, %v3193_v8 }
  0x2b   :  { %2353 = vmatpush3.msra.mxu0 %v3112_v25  ;;  %2380 = vmatpush3.msra.mxu1 %v172_v51  ;;  %v3220_v38 = vsub.f32 %v41_v54, %v3185_v63  ;;  %v207_v39 = vand.u32 4294901760, %v206_v9  ;;  %v220_v41 = vsub.f32 %v3179_v61, %v219_v19  ;;  %v138_v42 = vand.u32 4294901760, %v3205_v26 }
  0x2c   :  { %2354 = vmatprep.subr.mxu0 %v3047_v0  ;;  %2381 = vmatprep.subr.mxu1 %v3047_v0  ;;  %v233_v44 = vand.u32 4294901760, %v3208_v31  ;;  %v3231_v49 = vsub.f32 %v40_v60, %v3200_v13  ;;  %v214_v50 = vand.u32 4294901760, %v213_v36  ;;  %v227_v51 = vsub.f32 %v3193_v8, %v226_v37 }
  0x2d   :  { %2355 = vmatpush3.msra.mxu0 %v3116_v28  ;;  %2382 = vmatpush3.msra.mxu1 %v179_v56  ;;  %v240_v52 = vand.u32 4294901760, %v3220_v38  ;;  %v3241_v54 = vsub.f32 %v39_v7, %v3212_v32  ;;  %v221_v56 = vand.u32 4294901760, %v220_v41  ;;  %v139_v58 = vsub.f32 %v3205_v26, %v138_v42 }
  0x2e   :  { %2356 = vmatprep.subr.mxu0 %v3047_v0  ;;  %2383 = vmatprep.subr.mxu1 %v3047_v0  ;;  %v234_v60 = vsub.f32 %v3208_v31, %v233_v44  ;;  %v228_v2 = vand.u32 4294901760, %v227_v51 }
  0x2f   :  { %2357 = vmatpush3.msra.mxu0 %v3136_v35  ;;  %2384 = vmatpush3.msra.mxu1 %v186_v1  ;;  %v247_v1 = vand.u32 4294901760, %v3231_v49  ;;  %v241_v7 = vsub.f32 %v3220_v38, %v240_v52  ;;  %v254_v9 = vand.u32 4294901760, %v3241_v54 }
  0x30   :  { %2358 = vmatprep.subr.mxu0 %v3047_v0  ;;  %2385 = vmatprep.subr.mxu1 %v3047_v0 }
  0x31   :  { %2359 = vmatpush3.msra.mxu0 %v3151_v45  ;;  %2386 = vmatpush3.msra.mxu1 %v193_v14  ;;  %v140_v14 = vand.u32 4294901760, %v139_v58  ;;  %v248_v36 = vsub.f32 %v3231_v49, %v247_v1  ;;  %v255_v41 = vsub.f32 %v3241_v54, %v254_v9  ;;  %v704_v58 = vld [vmem:[#allocation5 + $0xb0] sm:$0xff] }
  0x32   :  { %2360 = vmatprep.subr.mxu0 %v3047_v0  ;;  %2387 = vmatprep.subr.mxu1 %v3047_v0 }
  0x33   :  { %2361 = vmatpush3.msra.mxu0 %v3159_v48  ;;  %2388 = vmatpush3.msra.mxu1 %v200_v33  ;;  %v235_v33 = vand.u32 4294901760, %v234_v60  ;;  %v256_v51 = vand.u32 4294901760, %v255_v41 }
  0x34   :  { %2362 = vmatprep.subr.mxu0 %v3047_v0  ;;  %2389 = vmatprep.subr.mxu1 %v3047_v0 }
  0x35   :  { %2363 = vmatpush3.msra.mxu0 %v3176_v59  ;;  %2390 = vmatpush3.msra.mxu1 %v207_v39  ;;  %v242_v39 = vand.u32 4294901760, %v241_v7  ;;  %v703_v7 = vld [vmem:[#allocation5 + $0xa8] sm:$0xff] }
  0x36   :  { %2364 = vmatprep.subr.mxu0 %v3047_v0  ;;  %2391 = vmatprep.subr.mxu1 %v3047_v0 }
  0x37   :  { %2365 = vmatpush3.msra.mxu0 %v3185_v63  ;;  %2392 = vmatpush3.msra.mxu1 %v214_v50  ;;  %v249_v50 = vand.u32 4294901760, %v248_v36  ;;  %v702_v36 = vld [vmem:[#allocation5 + $0xa0] sm:$0xff] }
  0x38   :  { %2366 = vmatprep.subr.mxu0 %v3047_v0  ;;  %2393 = vmatprep.subr.mxu1 %v3047_v0 }
  0x39   :  { %2367 = vmatpush3.msra.mxu0 %v3200_v13  ;;  %2394 = vmatpush3.msra.mxu1 %v221_v56 }
  0x3a   :  { %2368 = vmatprep.subr.mxu0 %v3047_v0  ;;  %2395 = vmatprep.subr.mxu1 %v3047_v0 }
  0x3b   :  { %2369 = vmatpush3.msra.mxu0 %v3212_v32  ;;  %2396 = vmatpush3.msra.mxu1 %v228_v2  ;;  %v3540_v2 = vand.u32 4294901760, %v704_v58 }
  0x3c   :  { %2397 = vmatprep.subr.mxu1 %v3047_v0  ;;  %2408 = vmatprep.subr.mxu0 %v3047_v0 }
  0x3d   :  { %2371 = vmatmul.mubr.f32.vlgmr.msra.gmra.mxu0 %v140_v14  ;;  %2398 = vmatpush3.msra.mxu1 %v235_v33  ;;  %v3546_v14 = vsub.f32 %v704_v58, %v3540_v2  ;;  %v3548_v33 = vand.u32 4294901760, %v703_v7 }
  0x3e   :  { %2409 = vmatpush3.msra.mxu0 %v3091_v15  ;;  %2399 = vmatprep.subr.mxu1 %v3047_v0  ;;  %v710_v15 = vld [vmem:[#allocation5 + $0xe0] sm:$0xff] }
  0x3f   :  { %2410 = vmatprep.subr.mxu0 %v3047_v0  ;;  %2400 = vmatpush3.msra.mxu1 %v242_v39  ;;  %v871_v41 = vand.u32 4294901760, %v3546_v14 }
  0x40   :  { %2411 = vmatpush3.msra.mxu0 %v3094_v16  ;;  %2401 = vmatprep.subr.mxu1 %v3047_v0  ;;  %v709_v16 = vld [vmem:[#allocation5 + $0xd8] sm:$0xff] }
  0x41   :  { %2412 = vmatprep.subr.mxu0 %v3047_v0  ;;  %2402 = vmatpush3.msra.mxu1 %v249_v50  ;;  %v3555_v50 = vsub.f32 %v703_v7, %v3548_v33 }
  0x42   :  { %2413 = vmatpush3.msra.mxu0 %v3099_v18  ;;  %2403 = vmatprep.subr.mxu1 %v3047_v0 }
  0x43   :  { %2414 = vmatprep.subr.mxu0 %v3047_v0  ;;  %2404 = vmatpush3.msra.mxu1 %v256_v51  ;;  %v3557_v51 = vand.u32 4294901760, %v702_v36 }
  0x44   :  { %2415 = vmatpush3.msra.mxu0 %v3103_v20  ;;  %2406 = vmatmul.mubr.f32.vlgmr.msra.gmra.mxu1 %v3181_v62 }
  0x45   :  { %2416 = vmatprep.subr.mxu0 %v3047_v0  ;;  %2443 = vmatprep.subr.mxu1 %v3047_v0 }
  0x46   :  { %2417 = vmatpush3.msra.mxu0 %v3106_v21  ;;  %2444 = vmatpush3.msra.mxu1 %v3077_v4  ;;  %v3455_v21 = vand.u32 4294901760, %v710_v15 }
  0x47   :  { %2418 = vmatprep.subr.mxu0 %v3047_v0  ;;  %2445 = vmatprep.subr.mxu1 %v3047_v0 }
  0x48   :  { %2419 = vmatpush3.msra.mxu0 %v3120_v30  ;;  %2446 = vmatpush3.msra.mxu1 %v3079_v5 }
  0x49   :  { %2420 = vmatprep.subr.mxu0 %v3047_v0  ;;  %2447 = vmatprep.subr.mxu1 %v3047_v0 }
  0x4a   :  { %2421 = vmatpush3.msra.mxu0 %v3133_v34  ;;  %2448 = vmatpush3.msra.mxu1 %v3081_v6 }
  0x4b   :  { %2422 = vmatprep.subr.mxu0 %v3047_v0  ;;  %2449 = vmatprep.subr.mxu1 %v3047_v0 }
  0x4c   :  { %2423 = vmatpush3.msra.mxu0 %v3148_v43  ;;  %2450 = vmatpush3.msra.mxu1 %v3083_v10 }
  0x4d   :  { %2424 = vmatprep.subr.mxu0 %v3047_v0  ;;  %2451 = vmatprep.subr.mxu1 %v3047_v0 }
  0x4e   :  { %2425 = vmatpush3.msra.mxu0 %v3155_v47  ;;  %2452 = vmatpush3.msra.mxu1 %v3085_v11 }
  0x4f   :  { %2426 = vmatprep.subr.mxu0 %v3047_v0  ;;  %2453 = vmatprep.subr.mxu1 %v3047_v0 }
  0x50   :  { %2427 = vmatpush3.msra.mxu0 %v3167_v55  ;;  %2454 = vmatpush3.msra.mxu1 %v3087_v12 }
  0x51   :  { %2428 = vmatprep.subr.mxu0 %v3047_v0  ;;  %2455 = vmatprep.subr.mxu1 %v3047_v0 }
  0x52   :  { %2429 = vmatpush3.msra.mxu0 %v3179_v61  ;;  %2456 = vmatpush3.msra.mxu1 %v3096_v17 }
  0x53   :  { %2430 = vmatprep.subr.mxu0 %v3047_v0  ;;  %2457 = vmatprep.subr.mxu1 %v3047_v0 }
  0x54   :  { %2431 = vmatpush3.msra.mxu0 %v3193_v8  ;;  %2458 = vmatpush3.msra.mxu1 %v3112_v25 }
  0x55   :  { %2432 = vmatprep.subr.mxu0 %v3047_v0  ;;  %2459 = vmatprep.subr.mxu1 %v3047_v0 }
  0x56   :  { %2433 = vmatpush3.msra.mxu0 %v3208_v31  ;;  %2460 = vmatpush3.msra.mxu1 %v3116_v28 }
  0x57   :  { %2434 = vmatprep.subr.mxu0 %v3047_v0  ;;  %2461 = vmatprep.subr.mxu1 %v3047_v0 }
  0x58   :  { %2435 = vmatpush3.msra.mxu0 %v3220_v38  ;;  %2462 = vmatpush3.msra.mxu1 %v3136_v35 }
  0x59   :  { %2436 = vmatprep.subr.mxu0 %v3047_v0  ;;  %2463 = vmatprep.subr.mxu1 %v3047_v0 }
  0x5a   :  { %2437 = vmatpush3.msra.mxu0 %v3231_v49  ;;  %2464 = vmatpush3.msra.mxu1 %v3151_v45 }
  0x5b   :  { %2438 = vmatprep.subr.mxu0 %v3047_v0  ;;  %2465 = vmatprep.subr.mxu1 %v3047_v0 }
  0x5c   :  { %2439 = vmatpush3.msra.mxu0 %v3241_v54  ;;  %2440 = vmatprep.mubr.msk.f32.mxu0 %vm3048_vm0, %v3047_v0 }
  0x5d   :  { %2466 = vmatpush3.msra.mxu1 %v3159_v48  ;;  %2441 = vmatmul.mubr.f32.vlgmr.msra.gmra.mxu0 %v3205_v26 }
  0x5e   :  { %2467 = vmatprep.subr.mxu1 %v3047_v0  ;;  %2478 = vmatprep.subr.mxu0 %v3047_v0 }
  0x5f   :  { %2468 = vmatpush3.msra.mxu1 %v3176_v59  ;;  %2479 = vmatpush3.msra.mxu0 %v149_v22  ;;  %v708_v22 = vld [vmem:[#allocation5 + $0xd0] sm:$0xff] }
  0x60   :  { %2469 = vmatprep.subr.mxu1 %v3047_v0  ;;  %2480 = vmatprep.subr.mxu0 %v3047_v0 }
  0x61   :  { %2470 = vmatpush3.msra.mxu1 %v3185_v63  ;;  %2481 = vmatpush3.msra.mxu0 %v156_v23  ;;  %v707_v23 = vld [vmem:[#allocation5 + $0xc8] sm:$0xff] }
  0x62   :  { %2471 = vmatprep.subr.mxu1 %v3047_v0  ;;  %2482 = vmatprep.subr.mxu0 %v3047_v0 }
  0x63   :  { %2472 = vmatpush3.msra.mxu1 %v3200_v13  ;;  %2483 = vmatpush3.msra.mxu0 %v163_v24  ;;  %v706_v24 = vld [vmem:[#allocation5 + $0xc0] sm:$0xff] }
  0x64   :  { %2473 = vmatprep.subr.mxu1 %v3047_v0  ;;  %2484 = vmatprep.subr.mxu0 %v3047_v0 }
  0x65   :  { %2474 = vmatpush3.msra.mxu1 %v3212_v32  ;;  %2475 = vmatprep.mubr.msk.f32.mxu1 %vm3048_vm0, %v3047_v0 }
  0x66   :  { %2485 = vmatpush3.msra.mxu0 %v170_v27  ;;  %2476 = vmatmul.mubr.f32.vlgmr.msra.gmra.mxu1 %v138_v42  ;;  %v3460_v27 = vand.u32 4294901760, %v708_v22 }
  0x67   :  { %2486 = vmatprep.subr.mxu0 %v3047_v0  ;;  %2513 = vmatprep.subr.mxu1 %v3047_v0 }
  0x68   :  { %2487 = vmatpush3.msra.mxu0 %v177_v29  ;;  %2514 = vmatpush3.msra.mxu1 %v3077_v4  ;;  %v713_v4 = vld [vmem:[#allocation5 + $0xf8] sm:$0xff]  ;;  %v3465_v29 = vand.u32 4294901760, %v706_v24 }
  0x69   :  { %2488 = vmatprep.subr.mxu0 %v3047_v0  ;;  %2515 = vmatprep.subr.mxu1 %v3047_v0 }
  0x6a   :  { %2489 = vmatpush3.msra.mxu0 %v184_v40  ;;  %2516 = vmatpush3.msra.mxu1 %v3079_v5  ;;  %v3440_v5 = vand.u32 4294901760, %v713_v4  ;;  %v3475_v40 = vsub.f32 %v710_v15, %v3455_v21  ;;  %v3489_v47 = vsub.f32 %v706_v24, %v3465_v29  ;;  %v3567_v15 = vsub.f32 %v702_v36, %v3557_v51 }
  0x6b   :  { %2490 = vmatprep.subr.mxu0 %v3047_v0  ;;  %2517 = vmatprep.subr.mxu1 %v3047_v0 }
  0x6c   :  { %2491 = vmatpush3.msra.mxu0 %v191_v46  ;;  %2518 = vmatpush3.msra.mxu1 %v3081_v6  ;;  %v712_v6 = vld [vmem:[#allocation5 + $0xf0] sm:$0xff]  ;;  %v857_v31 = vand.u32 4294901760, %v3489_v47 }
  0x6d   :  { %2492 = vmatprep.subr.mxu0 %v3047_v0  ;;  %2519 = vmatprep.subr.mxu1 %v3047_v0 }
  0x6e   :  { %2493 = vmatpush3.msra.mxu0 %v198_v53  ;;  %2520 = vmatpush3.msra.mxu1 %v3083_v10  ;;  %v3443_v10 = vsub.f32 %v713_v4, %v3440_v5  ;;  %v858_v56 = vsub.f32 %v3489_v47, %v857_v31  ;;  %v701_v4 = vld [vmem:[#allocation5 + $0x98] sm:$0xff] }
  0x6f   :  { %2494 = vmatprep.subr.mxu0 %v3047_v0  ;;  %2521 = vmatprep.subr.mxu1 %v3047_v0 }
  0x70   :  { %2495 = vmatpush3.msra.mxu0 %v205_v57  ;;  %2522 = vmatpush3.msra.mxu1 %v3085_v11  ;;  %v3445_v11 = vand.u32 4294901760, %v712_v6 }
  0x71   :  { %2496 = vmatprep.subr.mxu0 %v3047_v0  ;;  %2523 = vmatprep.subr.mxu1 %v3047_v0 }
  0x72   :  { %2497 = vmatpush3.msra.mxu0 %v212_v3  ;;  %2524 = vmatpush3.msra.mxu1 %v3087_v12  ;;  %v711_v12 = vld [vmem:[#allocation5 + $0xe8] sm:$0xff]  ;;  %v3451_v18 = vsub.f32 %v712_v6, %v3445_v11  ;;  %v872_v6 = vsub.f32 %v3546_v14, %v871_v41 }
  0x73   :  { %2498 = vmatprep.subr.mxu0 %v3047_v0  ;;  %2525 = vmatprep.subr.mxu1 %v3047_v0  ;;  %v3453_v20 = vand.u32 4294901760, %v711_v12 }
  0x74   :  { %2499 = vmatpush3.msra.mxu0 %v219_v19  ;;  %2526 = vmatpush3.msra.mxu1 %v3096_v17  ;;  %v808_v17 = vand.u32 4294901760, %v3443_v10  ;;  %v815_v34 = vand.u32 4294901760, %v3451_v18 }
  0x75   :  { %2500 = vmatprep.subr.mxu0 %v3047_v0  ;;  %2527 = vmatprep.subr.mxu1 %v3047_v0 }
  0x76   :  { %2501 = vmatpush3.msra.mxu0 %v226_v37  ;;  %2528 = vmatpush3.msra.mxu1 %v3112_v25  ;;  %v3458_v25 = vand.u32 4294901760, %v709_v16  ;;  %v809_v30 = vsub.f32 %v3443_v10, %v808_v17  ;;  %v816_v55 = vsub.f32 %v3451_v18, %v815_v34 }
  0x77   :  { %2502 = vmatprep.subr.mxu0 %v3047_v0  ;;  %2529 = vmatprep.subr.mxu1 %v3047_v0 }
  0x78   :  { %2503 = vmatpush3.msra.mxu0 %v233_v44  ;;  %2530 = vmatpush3.msra.mxu1 %v3116_v28  ;;  %v3463_v28 = vand.u32 4294901760, %v707_v23  ;;  %v3479_v43 = vsub.f32 %v709_v16, %v3458_v25  ;;  %v810_v53 = vand.u32 4294901760, %v809_v30  ;;  %v817_v3 = vand.u32 4294901760, %v816_v55  ;;  %v699_v55 = vld [vmem:[#allocation5 + $0x88] sm:$0xff] }
  0x79   :  { %2504 = vmatprep.subr.mxu0 %v3047_v0  ;;  %2531 = vmatprep.subr.mxu1 %v3047_v0  ;;  %v3569_v16 = vand.u32 4294901760, %v701_v4  ;;  %v885_v30 = vand.u32 4294901760, %v3567_v15 }
  0x7a   :  { %2505 = vmatpush3.msra.mxu0 %v240_v52  ;;  %2532 = vmatpush3.msra.mxu1 %v3136_v35  ;;  %v3472_v35 = vsub.f32 %v711_v12, %v3453_v20  ;;  %v3485_v46 = vsub.f32 %v707_v23, %v3463_v28  ;;  %v836_v61 = vand.u32 4294901760, %v3479_v43  ;;  %v878_v12 = vand.u32 4294901760, %v3555_v50 }
  0x7b   :  { %2506 = vmatprep.subr.mxu0 %v3047_v0  ;;  %2533 = vmatprep.subr.mxu1 %v3047_v0  ;;  %v873_v23 = vand.u32 4294901760, %v872_v6 }
  0x7c   :  { %2507 = vmatpush3.msra.mxu0 %v247_v1  ;;  %2534 = vmatpush3.msra.mxu1 %v3151_v45  ;;  %v3482_v45 = vsub.f32 %v708_v22, %v3460_v27  ;;  %v822_v57 = vand.u32 4294901760, %v3472_v35  ;;  %v837_v26 = vsub.f32 %v3479_v43, %v836_v61  ;;  %v700_v22 = vld [vmem:[#allocation5 + $0x90] sm:$0xff]  ;;  %v879_v24 = vsub.f32 %v3555_v50, %v878_v12 }
  0x7d   :  { %2508 = vmatprep.subr.mxu0 %v3047_v0  ;;  %2535 = vmatprep.subr.mxu1 %v3047_v0 }
  0x7e   :  { %2509 = vmatpush3.msra.mxu0 %v254_v9  ;;  %2510 = vmatprep.mubr.msk.f32.mxu0 %vm3048_vm0, %v3047_v0  ;;  %v823_v8 = vsub.f32 %v3472_v35, %v822_v57  ;;  %v838_v44 = vand.u32 4294901760, %v837_v26  ;;  %v859_v9 = vand.u32 4294901760, %v858_v56  ;;  %v3590_v26 = vand.u32 4294901760, %v699_v55 }
  0x7f   :  { %2536 = vmatpush3.msra.mxu1 %v3159_v48  ;;  %2511 = vmatmul.mubr.f32.vlgmr.msra.gmra.mxu0 %v3181_v62  ;;  %v705_v48 = vld [vmem:[#allocation5 + $0xb8] sm:$0xff] }
  0x80   :  { %2537 = vmatprep.subr.mxu1 %v3047_v0  ;;  %2545 = vmatprep.mubr.msk.f32.mxu1 %vm3048_vm0, %v3047_v0  ;;  %v3508_v19 = vand.u32 4294901760, %v705_v48 }
  0x81   :  { %2538 = vmatpush3.msra.mxu1 %v3176_v59  ;;  %2548 = vmatprep.subr.mxu0 %v3047_v0  ;;  %v829_v59 = vand.u32 4294901760, %v3475_v40 }
  0x82   :  { %2539 = vmatprep.subr.mxu1 %v3047_v0  ;;  %2580 = vmatprep.mubr.msk.f32.mxu0 %vm3048_vm0, %v3047_v0  ;;  %v3519_v42 = vsub.f32 %v705_v48, %v3508_v19  ;;  %v3579_v48 = vsub.f32 %v701_v4, %v3569_v16 }
  0x83   :  { %2540 = vmatpush3.msra.mxu1 %v3185_v63  ;;  %2549 = vmatpush3.msra.mxu0 %v3440_v5  ;;  %v850_v63 = vand.u32 4294901760, %v3485_v46 }
  0x84   :  { %2541 = vmatprep.subr.mxu1 %v3047_v0  ;;  %2550 = vmatprep.subr.mxu0 %v3047_v0  ;;  %v864_v52 = vand.u32 4294901760, %v3519_v42 }
  0x85   :  { %2542 = vmatpush3.msra.mxu1 %v3200_v13  ;;  %2551 = vmatpush3.msra.mxu0 %v3445_v11  ;;  %v830_v13 = vsub.f32 %v3475_v40, %v829_v59  ;;  %v851_v49 = vsub.f32 %v3485_v46, %v850_v63 }
  0x86   :  { %2543 = vmatprep.subr.mxu1 %v3047_v0  ;;  %2552 = vmatprep.subr.mxu0 %v3047_v0  ;;  %v865_v1 = vsub.f32 %v3519_v42, %v864_v52 }
  0x87   :  { %2544 = vmatpush3.msra.mxu1 %v3212_v32  ;;  %2553 = vmatpush3.msra.mxu0 %v3453_v20  ;;  %v824_v32 = vand.u32 4294901760, %v823_v8  ;;  %v831_v37 = vand.u32 4294901760, %v830_v13  ;;  %v852_v60 = vand.u32 4294901760, %v851_v49  ;;  %v886_v8 = vsub.f32 %v3567_v15, %v885_v30 }
  0x88   :  { %2546 = vmatmul.mubr.f32.vlgmr.msra.gmra.mxu1 %v3181_v62  ;;  %2583 = vmatprep.subr.mxu1 %v3047_v0  ;;  %v843_v62 = vand.u32 4294901760, %v3482_v45  ;;  %v866_v39 = vand.u32 4294901760, %v865_v1  ;;  %v4161_v13 = vand.u32 4294901760, %v3579_v48  ;;  %v3602_v49 = vsub.f32 %v699_v55, %v3590_v26 }
  0x89   :  { %2615 = vmatprep.mubr.msk.f32.mxu1 %vm3048_vm0, %v3047_v0  ;;  %2554 = vmatprep.subr.mxu0 %v3047_v0 }
  0x8a   :  { %2555 = vmatpush3.msra.mxu0 %v3455_v21  ;;  %2584 = vmatpush3.msra.mxu1 %v810_v53  ;;  %v844_v38 = vsub.f32 %v3482_v45, %v843_v62  ;;  %v3583_v53 = vand.u32 4294901760, %v700_v22 }
  0x8b   :  { %2556 = vmatprep.subr.mxu0 %v3047_v0  ;;  %2585 = vmatprep.subr.mxu1 %v3047_v0 }
  0x8c   :  { %2557 = vmatpush3.msra.mxu0 %v3458_v25  ;;  %2586 = vmatpush3.msra.mxu1 %v817_v3  ;;  %v845_v54 = vand.u32 4294901760, %v844_v38  ;;  %v880_v3 = vand.u32 4294901760, %v879_v24  ;;  %v887_v38 = vand.u32 4294901760, %v886_v8 }
  0x8d   :  { %2558 = vmatprep.subr.mxu0 %v3047_v0  ;;  %2587 = vmatprep.subr.mxu1 %v3047_v0 }
  0x8e   :  { %2559 = vmatpush3.msra.mxu0 %v3460_v27  ;;  %2588 = vmatpush3.msra.mxu1 %v824_v32  ;;  %v3595_v32 = vsub.f32 %v700_v22, %v3583_v53 }
  0x8f   :  { %2560 = vmatprep.subr.mxu0 %v3047_v0  ;;  %2589 = vmatprep.subr.mxu1 %v3047_v0 }
  0x90   :  { %2561 = vmatpush3.msra.mxu0 %v3463_v28  ;;  %2590 = vmatpush3.msra.mxu1 %v831_v37  ;;  %v698_v37 = vld [vmem:[#allocation5 + $0x80] sm:$0xff]  ;;  %v4160_v56 = vand.u32 4294901760, %v3595_v32 }
  0x91   :  { %2562 = vmatprep.subr.mxu0 %v3047_v0  ;;  %2591 = vmatprep.subr.mxu1 %v3047_v0 }
  0x92   :  { %2563 = vmatpush3.msra.mxu0 %v3465_v29  ;;  %2592 = vmatpush3.msra.mxu1 %v838_v44  ;;  %v893_v44 = vsub.f32 %v3579_v48, %v4161_v13  ;;  %v900_v7 = vsub.f32 %v3595_v32, %v4160_v56 }
  0x93   :  { %2564 = vmatprep.subr.mxu0 %v3047_v0  ;;  %2593 = vmatprep.subr.mxu1 %v3047_v0 }
  0x94   :  { %2565 = vmatpush3.msra.mxu0 %v3508_v19  ;;  %2594 = vmatpush3.msra.mxu1 %v845_v54  ;;  %v3604_v54 = vand.u32 4294901760, %v698_v37  ;;  %v894_v58 = vand.u32 4294901760, %v893_v44 }
  0x95   :  { %2566 = vmatprep.subr.mxu0 %v3047_v0  ;;  %2595 = vmatprep.subr.mxu1 %v3047_v0 }
  0x96   :  { %2567 = vmatpush3.msra.mxu0 %v3540_v2  ;;  %2596 = vmatpush3.msra.mxu1 %v852_v60  ;;  %v4159_v60 = vand.u32 4294901760, %v3602_v49  ;;  %v3612_v1 = vsub.f32 %v698_v37, %v3604_v54 }
  0x97   :  { %2568 = vmatprep.subr.mxu0 %v3047_v0  ;;  %2597 = vmatprep.subr.mxu1 %v3047_v0 }
  0x98   :  { %2569 = vmatpush3.msra.mxu0 %v3548_v33  ;;  %2598 = vmatpush3.msra.mxu1 %v859_v9  ;;  %v907_v9 = vsub.f32 %v3602_v49, %v4159_v60  ;;  %v4158_v36 = vand.u32 4294901760, %v3612_v1 }
  0x99   :  { %2570 = vmatprep.subr.mxu0 %v3047_v0  ;;  %2599 = vmatprep.subr.mxu1 %v3047_v0 }
  0x9a   :  { %2571 = vmatpush3.msra.mxu0 %v3557_v51  ;;  %2600 = vmatpush3.msra.mxu1 %v866_v39  ;;  %v901_v39 = vand.u32 4294901760, %v900_v7  ;;  %v908_v4 = vand.u32 4294901760, %v907_v9  ;;  %v914_v6 = vsub.f32 %v3612_v1, %v4158_v36 }
  0x9b   :  { %2572 = vmatprep.subr.mxu0 %v3047_v0  ;;  %2601 = vmatprep.subr.mxu1 %v3047_v0 }
  0x9c   :  { %2573 = vmatpush3.msra.mxu0 %v3569_v16  ;;  %2602 = vmatpush3.msra.mxu1 %v873_v23  ;;  %v915_v22 = vand.u32 4294901760, %v914_v6 }
  0x9d   :  { %2574 = vmatprep.subr.mxu0 %v3047_v0  ;;  %2603 = vmatprep.subr.mxu1 %v3047_v0 }
  0x9e   :  { %2575 = vmatpush3.msra.mxu0 %v3583_v53  ;;  %2604 = vmatpush3.msra.mxu1 %v880_v3 }
  0x9f   :  { %2576 = vmatprep.subr.mxu0 %v3047_v0  ;;  %2605 = vmatprep.subr.mxu1 %v3047_v0 }
  0xa0   :  { %2577 = vmatpush3.msra.mxu0 %v3590_v26  ;;  %2606 = vmatpush3.msra.mxu1 %v887_v38 }
  0xa1   :  { %2578 = vmatprep.subr.mxu0 %v3047_v0  ;;  %2607 = vmatprep.subr.mxu1 %v3047_v0 }
  0xa2   :  { %2579 = vmatpush3.msra.mxu0 %v3604_v54  ;;  %2608 = vmatpush3.msra.mxu1 %v894_v58 }
  0xa3   :  { %2618 = vmatprep.subr.mxu0 %v3047_v0  ;;  %2609 = vmatprep.subr.mxu1 %v3047_v0 }
  0xa4   :  { %2610 = vmatpush3.msra.mxu1 %v901_v39 }
  0xa5   :  { %2611 = vmatprep.subr.mxu1 %v3047_v0 }
  0xa6   :  { %2612 = vmatpush3.msra.mxu1 %v908_v4 }
  0xa7   :  { %2613 = vmatprep.subr.mxu1 %v3047_v0 }
  0xa8   :  { %2614 = vmatpush3.msra.mxu1 %v915_v22 }
  0xa9   :  { %2653 = vmatprep.subr.mxu1 %v3047_v0 }
  0xfd   :  { %v142_v23 = vpop.f32.mrf.mxu0 }
  0xff   :  { %v2372_v24 = vpop.f32.mrf.mxu0 }
 0x104   :  { %v293_v55 = vpop.f32.mrf.mxu1 }
 0x105   :  { %v294_v7 = vadd.f32 %v293_v55, %v142_v23 }
 0x106   :  { %v2407_v3 = vpop.f32.mrf.mxu1 }
 0x11d   :  { %v397_v8 = vpop.f32.mrf.mxu0 }
 0x11e   :  { %v398_v39 = vadd.f32 %v397_v8, %v294_v7  ;;  %v1364_v8 = vld [vmem:[#allocation5 + $0x138] sm:$0xff] }
 0x11f   :  { %v2442_v37 = vpop.f32.mrf.mxu0 }
 0x126   :  { %v486_v38 = vpop.f32.mrf.mxu1 }
 0x127   :  { %v487_v36 = vadd.f32 %v486_v38, %v398_v39 }
 0x128   :  { %v2477_v44 = vpop.f32.mrf.mxu1 }
 0x129   :  { %v3888_v44 = vand.u32 4294901760, %v1364_v8 }
 0x13f   :  { %v605_v58 = vpop.f32.mrf.mxu0 }
 0x140   :  { %v606_v6 = vadd.f32 %v605_v58, %v487_v36  ;;  %v1363_v58 = vld [vmem:[#allocation5 + $0x130] sm:$0xff] }
 0x141   :  { %v2512_v9 = vpop.f32.mrf.mxu0  ;;  %v3896_v39 = vand.u32 4294901760, %v1363_v58 }
 0x142   :  { %v3894_v9 = vsub.f32 %v1364_v8, %v3888_v44 }
 0x148   :  { %v692_v4 = vpop.f32.mrf.mxu1 }
 0x149   :  { %v693_v60 = vadd.f32 %v692_v4, %v606_v6  ;;  %v1362_v6 = vld [vmem:[#allocation5 + $0x128] sm:$0xff] }
 0x14a   :  { %v2547_v56 = vpop.f32.mrf.mxu1 }
 0x14b   :  { %v696_v22 = vmax.f32 %v693_v60, 0.0 }
 0x14d   :  { %v3632_v13 = vand.u32 4294901760, %v696_v22 }
 0x14f   :  { %v3635_v24 = vsub.f32 %v696_v22, %v3632_v13  ;;  %2616 = vmatmul.mubr.f32.vlgmr.msra.gmra.mxu1 %v3632_v13  ;;  %v1523_v22 = vand.u32 4294901760, %v3894_v9 }
 0x150   :  { %2654 = vmatpush3.msra.mxu1 %v3440_v5  ;;  %2685 = vmatprep.mubr.msk.f32.mxu1 %vm3048_vm0, %v3047_v0 }
 0x151   :  { %v797_v23 = vand.u32 4294901760, %v3635_v24  ;;  %2655 = vmatprep.subr.mxu1 %v3047_v0 }
 0x152   :  { %2656 = vmatpush3.msra.mxu1 %v3445_v11 }
 0x153   :  { %v798_v56 = vsub.f32 %v3635_v24, %v797_v23  ;;  %2657 = vmatprep.subr.mxu1 %v3047_v0 }
 0x154   :  { %2658 = vmatpush3.msra.mxu1 %v3453_v20 }
 0x155   :  { %2659 = vmatprep.subr.mxu1 %v3047_v0  ;;  %v799_v60 = vand.u32 4294901760, %v798_v56  ;;  %v1361_v56 = vld [vmem:[#allocation5 + $0x120] sm:$0xff] }
 0x156   :  { %2660 = vmatpush3.msra.mxu1 %v3455_v21 }
 0x157   :  { %2661 = vmatprep.subr.mxu1 %v3047_v0  ;;  %2581 = vmatmul.mubr.f32.vlgmr.msra.gmra.mxu0 %v799_v60  ;;  %v1524_v60 = vsub.f32 %v3894_v9, %v1523_v22 }
 0x158   :  { %2619 = vmatpush3.msra.mxu0 %v3443_v10  ;;  %2662 = vmatpush3.msra.mxu1 %v3458_v25  ;;  %v4167_v10 = vand.u32 4294901760, %v3595_v32 }
 0x159   :  { %2620 = vmatprep.subr.mxu0 %v3047_v0  ;;  %2663 = vmatprep.subr.mxu1 %v3047_v0 }
 0x15a   :  { %2621 = vmatpush3.msra.mxu0 %v3451_v18  ;;  %2664 = vmatpush3.msra.mxu1 %v3460_v27  ;;  %v1372_v18 = vld [vmem:[#allocation5 + $0x178] sm:$0xff] }
 0x15b   :  { %2622 = vmatprep.subr.mxu0 %v3047_v0  ;;  %2665 = vmatprep.subr.mxu1 %v3047_v0 }
 0x15c   :  { %2623 = vmatpush3.msra.mxu0 %v3472_v35  ;;  %2666 = vmatpush3.msra.mxu1 %v3463_v28 }
 0x15d   :  { %2624 = vmatprep.subr.mxu0 %v3047_v0  ;;  %2667 = vmatprep.subr.mxu1 %v3047_v0 }
 0x15e   :  { %2625 = vmatpush3.msra.mxu0 %v3475_v40  ;;  %2668 = vmatpush3.msra.mxu1 %v3465_v29 }
 0x15f   :  { %2626 = vmatprep.subr.mxu0 %v3047_v0  ;;  %2669 = vmatprep.subr.mxu1 %v3047_v0 }
 0x160   :  { %2627 = vmatpush3.msra.mxu0 %v3479_v43  ;;  %2670 = vmatpush3.msra.mxu1 %v3508_v19 }
 0x161   :  { %2628 = vmatprep.subr.mxu0 %v3047_v0  ;;  %2671 = vmatprep.subr.mxu1 %v3047_v0 }
 0x162   :  { %2629 = vmatpush3.msra.mxu0 %v3482_v45  ;;  %2672 = vmatpush3.msra.mxu1 %v3540_v2  ;;  %v1367_v45 = vld [vmem:[#allocation5 + $0x150] sm:$0xff] }
 0x163   :  { %2630 = vmatprep.subr.mxu0 %v3047_v0  ;;  %2673 = vmatprep.subr.mxu1 %v3047_v0 }
 0x164   :  { %2631 = vmatpush3.msra.mxu0 %v3485_v46  ;;  %2674 = vmatpush3.msra.mxu1 %v3548_v33  ;;  %v1366_v46 = vld [vmem:[#allocation5 + $0x148] sm:$0xff] }
 0x165   :  { %2632 = vmatprep.subr.mxu0 %v3047_v0  ;;  %2675 = vmatprep.subr.mxu1 %v3047_v0 }
 0x166   :  { %2633 = vmatpush3.msra.mxu0 %v3489_v47  ;;  %2676 = vmatpush3.msra.mxu1 %v3557_v51  ;;  %v1365_v47 = vld [vmem:[#allocation5 + $0x140] sm:$0xff] }
 0x167   :  { %2634 = vmatprep.subr.mxu0 %v3047_v0  ;;  %2677 = vmatprep.subr.mxu1 %v3047_v0 }
 0x168   :  { %2635 = vmatpush3.msra.mxu0 %v3519_v42  ;;  %2678 = vmatpush3.msra.mxu1 %v3569_v16  ;;  %v3833_v42 = vand.u32 4294901760, %v1365_v47 }
 0x169   :  { %2636 = vmatprep.subr.mxu0 %v3047_v0  ;;  %2679 = vmatprep.subr.mxu1 %v3047_v0 }
 0x16a   :  { %2637 = vmatpush3.msra.mxu0 %v3546_v14  ;;  %2680 = vmatpush3.msra.mxu1 %v3583_v53 }
 0x16b   :  { %2638 = vmatprep.subr.mxu0 %v3047_v0  ;;  %2681 = vmatprep.subr.mxu1 %v3047_v0 }
 0x16c   :  { %2639 = vmatpush3.msra.mxu0 %v3555_v50  ;;  %2682 = vmatpush3.msra.mxu1 %v3590_v26 }
 0x16d   :  { %2640 = vmatprep.subr.mxu0 %v3047_v0  ;;  %2683 = vmatprep.subr.mxu1 %v3047_v0 }
 0x16e   :  { %2641 = vmatpush3.msra.mxu0 %v3567_v15  ;;  %2684 = vmatpush3.msra.mxu1 %v3604_v54 }
 0x16f   :  { %2642 = vmatprep.subr.mxu0 %v3047_v0  ;;  %2686 = vmatmul.mubr.f32.vlgmr.msra.gmra.mxu1 %v797_v23  ;;  %v3905_v23 = vand.u32 4294901760, %v1362_v6 }
 0x170   :  { %2723 = vmatprep.subr.mxu1 %v3047_v0  ;;  %2643 = vmatpush3.msra.mxu0 %v3579_v48 }
 0x171   :  { %2724 = vmatpush3.msra.mxu1 %v3440_v5  ;;  %2644 = vmatprep.subr.mxu0 %v3047_v0  ;;  %v4166_v5 = vand.u32 4294901760, %v3579_v48 }
 0x172   :  { %2725 = vmatprep.subr.mxu1 %v3047_v0  ;;  %2645 = vmatpush3.msra.mxu0 %v3595_v32 }
 0x173   :  { %2726 = vmatpush3.msra.mxu1 %v3445_v11  ;;  %2646 = vmatprep.subr.mxu0 %v3047_v0  ;;  %v4168_v11 = vand.u32 4294901760, %v3602_v49 }
 0x174   :  { %2727 = vmatprep.subr.mxu1 %v3047_v0  ;;  %2647 = vmatpush3.msra.mxu0 %v3602_v49 }
 0x175   :  { %2728 = vmatpush3.msra.mxu1 %v3453_v20  ;;  %2648 = vmatprep.subr.mxu0 %v3047_v0  ;;  %v3799_v20 = vand.u32 4294901760, %v1372_v18 }
 0x176   :  { %2729 = vmatprep.subr.mxu1 %v3047_v0  ;;  %2649 = vmatpush3.msra.mxu0 %v3612_v1 }
 0x177   :  { %2650 = vmatprep.mubr.msk.f32.mxu0 %vm3048_vm0, %v3047_v0  ;;  %2730 = vmatpush3.msra.mxu1 %v3455_v21  ;;  %v1371_v21 = vld [vmem:[#allocation5 + $0x170] sm:$0xff] }
 0x178   :  { %2651 = vmatmul.mubr.f32.vlgmr.msra.gmra.mxu0 %v3635_v24  ;;  %2688 = vmatprep.subr.mxu0 %v3047_v0  ;;  %v3903_v24 = vsub.f32 %v1363_v58, %v3896_v39 }
 0x179   :  { %2731 = vmatprep.subr.mxu1 %v3047_v0  ;;  %2689 = vmatpush3.msra.mxu0 %v808_v17  ;;  %v4169_v17 = vand.u32 4294901760, %v3612_v1 }
 0x17a   :  { %2732 = vmatpush3.msra.mxu1 %v3458_v25  ;;  %2690 = vmatprep.subr.mxu0 %v3047_v0  ;;  %v3802_v25 = vsub.f32 %v1372_v18, %v3799_v20  ;;  %v1525_v18 = vand.u32 4294901760, %v1524_v60 }
 0x17b   :  { %2733 = vmatprep.subr.mxu1 %v3047_v0  ;;  %2691 = vmatpush3.msra.mxu0 %v815_v34  ;;  %v1368_v34 = vld [vmem:[#allocation5 + $0x158] sm:$0xff] }
 0x17c   :  { %2734 = vmatpush3.msra.mxu1 %v3460_v27  ;;  %2692 = vmatprep.subr.mxu0 %v3047_v0  ;;  %v3804_v27 = vand.u32 4294901760, %v1371_v21  ;;  %v3811_v43 = vand.u32 4294901760, %v1368_v34 }
 0x17d   :  { %2735 = vmatprep.subr.mxu1 %v3047_v0  ;;  %2693 = vmatpush3.msra.mxu0 %v822_v57  ;;  %v1467_v57 = vand.u32 4294901760, %v3802_v25 }
 0x17e   :  { %2736 = vmatpush3.msra.mxu1 %v3463_v28  ;;  %2694 = vmatprep.subr.mxu0 %v3047_v0  ;;  %v1370_v28 = vld [vmem:[#allocation5 + $0x168] sm:$0xff] }
 0x17f   :  { %2737 = vmatprep.subr.mxu1 %v3047_v0  ;;  %2695 = vmatpush3.msra.mxu0 %v829_v59  ;;  %v3807_v35 = vand.u32 4294901760, %v1370_v28  ;;  %v3816_v59 = vsub.f32 %v1371_v21, %v3804_v27 }
 0x180   :  { %2738 = vmatpush3.msra.mxu1 %v3465_v29  ;;  %2696 = vmatprep.subr.mxu0 %v3047_v0  ;;  %v1369_v29 = vld [vmem:[#allocation5 + $0x160] sm:$0xff] }
 0x181   :  { %2739 = vmatprep.subr.mxu1 %v3047_v0  ;;  %2697 = vmatpush3.msra.mxu0 %v836_v61  ;;  %v3809_v40 = vand.u32 4294901760, %v1369_v29  ;;  %v3819_v61 = vand.u32 4294901760, %v1367_v45 }
 0x182   :  { %2740 = vmatpush3.msra.mxu1 %v3508_v19  ;;  %2698 = vmatprep.subr.mxu0 %v3047_v0 }
 0x183   :  { %2741 = vmatprep.subr.mxu1 %v3047_v0  ;;  %2699 = vmatpush3.msra.mxu0 %v843_v62  ;;  %v3821_v62 = vand.u32 4294901760, %v1366_v46  ;;  %v3827_v19 = vsub.f32 %v1369_v29, %v3809_v40  ;;  %v3840_v14 = vsub.f32 %v1367_v45, %v3819_v61  ;;  %v1359_v45 = vld [vmem:[#allocation5 + $0x110] sm:$0xff] }
 0x184   :  { %2742 = vmatpush3.msra.mxu1 %v3540_v2  ;;  %2700 = vmatprep.subr.mxu0 %v3047_v0  ;;  %v1474_v2 = vand.u32 4294901760, %v3816_v59 }
 0x185   :  { %2743 = vmatprep.subr.mxu1 %v3047_v0  ;;  %2701 = vmatpush3.msra.mxu0 %v850_v63  ;;  %v3824_v63 = vsub.f32 %v1370_v28, %v3807_v35  ;;  %v1488_v50 = vand.u32 4294901760, %v3827_v19 }
 0x186   :  { %2744 = vmatpush3.msra.mxu1 %v3548_v33  ;;  %2702 = vmatprep.subr.mxu0 %v3047_v0  ;;  %v3844_v33 = vsub.f32 %v1366_v46, %v3821_v62  ;;  %v1475_v15 = vsub.f32 %v3816_v59, %v1474_v2 }
 0x187   :  { %2745 = vmatprep.subr.mxu1 %v3047_v0  ;;  %2703 = vmatpush3.msra.mxu0 %v857_v31  ;;  %v3830_v31 = vsub.f32 %v1368_v34, %v3811_v43 }
 0x188   :  { %2746 = vmatpush3.msra.mxu1 %v3557_v51  ;;  %2704 = vmatprep.subr.mxu0 %v3047_v0  ;;  %v1509_v32 = vand.u32 4294901760, %v3844_v33 }
 0x189   :  { %2747 = vmatprep.subr.mxu1 %v3047_v0  ;;  %2705 = vmatpush3.msra.mxu0 %v864_v52  ;;  %v1468_v52 = vsub.f32 %v3802_v25, %v1467_v57  ;;  %v1495_v51 = vand.u32 4294901760, %v3830_v31 }
 0x18a   :  { %2748 = vmatpush3.msra.mxu1 %v3569_v16  ;;  %2706 = vmatprep.subr.mxu0 %v3047_v0  ;;  %v1502_v16 = vand.u32 4294901760, %v3840_v14  ;;  %v1510_v3 = vsub.f32 %v3844_v33, %v1509_v32 }
 0x18b   :  { %2749 = vmatprep.subr.mxu1 %v3047_v0  ;;  %2707 = vmatpush3.msra.mxu0 %v871_v41  ;;  %v1481_v41 = vand.u32 4294901760, %v3824_v63 }
 0x18c   :  { %2750 = vmatpush3.msra.mxu1 %v3583_v53  ;;  %2708 = vmatprep.subr.mxu0 %v3047_v0  ;;  %v1489_v53 = vsub.f32 %v3827_v19, %v1488_v50  ;;  %v1503_v1 = vsub.f32 %v3840_v14, %v1502_v16  ;;  %v1511_v7 = vand.u32 4294901760, %v1510_v3 }
 0x18d   :  { %2751 = vmatprep.subr.mxu1 %v3047_v0  ;;  %2709 = vmatpush3.msra.mxu0 %v878_v12  ;;  %v1469_v12 = vand.u32 4294901760, %v1468_v52  ;;  %v1482_v48 = vsub.f32 %v3824_v63, %v1481_v41 }
 0x18e   :  { %2752 = vmatpush3.msra.mxu1 %v3590_v26  ;;  %2710 = vmatprep.subr.mxu0 %v3047_v0  ;;  %v1496_v26 = vsub.f32 %v3830_v31, %v1495_v51  ;;  %v1504_v37 = vand.u32 4294901760, %v1503_v1  ;;  %v1357_v1 = vld [vmem:[#allocation5 + $0x100] sm:$0xff] }
 0x18f   :  { %2753 = vmatprep.subr.mxu1 %v3047_v0  ;;  %2711 = vmatpush3.msra.mxu0 %v885_v30  ;;  %v3856_v30 = vsub.f32 %v1365_v47, %v3833_v42  ;;  %v1483_v49 = vand.u32 4294901760, %v1482_v48  ;;  %v1358_v48 = vld [vmem:[#allocation5 + $0x108] sm:$0xff] }
 0x190   :  { %2754 = vmatpush3.msra.mxu1 %v3604_v54  ;;  %2755 = vmatprep.mubr.msk.f32.mxu1 %vm3048_vm0, %v3047_v0  ;;  %v1490_v54 = vand.u32 4294901760, %v1489_v53  ;;  %v1497_v55 = vand.u32 4294901760, %v1496_v26 }
 0x191   :  { %2712 = vmatprep.subr.mxu0 %v3047_v0  ;;  %2756 = vmatmul.mubr.f32.vlgmr.msra.gmra.mxu1 %v3632_v13  ;;  %v1516_v36 = vand.u32 4294901760, %v3856_v30 }
 0x192   :  { %2713 = vmatpush3.msra.mxu0 %v4166_v5  ;;  %2720 = vmatprep.mubr.msk.f32.mxu0 %vm3048_vm0, %v3047_v0  ;;  %v1530_v5 = vand.u32 4294901760, %v3903_v24 }
 0x193   :  { %2714 = vmatprep.subr.mxu0 %v3047_v0  ;;  %2793 = vmatprep.subr.mxu1 %v3047_v0  ;;  %v1517_v38 = vsub.f32 %v3856_v30, %v1516_v36 }
 0x194   :  { %2715 = vmatpush3.msra.mxu0 %v4167_v10  ;;  %2825 = vmatprep.mubr.msk.f32.mxu1 %vm3048_vm0, %v3047_v0  ;;  %v3915_v10 = vsub.f32 %v1362_v6, %v3905_v23  ;;  %v1531_v21 = vsub.f32 %v3903_v24, %v1530_v5 }
 0x195   :  { %2716 = vmatprep.subr.mxu0 %v3047_v0  ;;  %2794 = vmatpush3.msra.mxu1 %v1469_v12  ;;  %v1518_v4 = vand.u32 4294901760, %v1517_v38  ;;  %v3938_v12 = vand.u32 4294901760, %v1359_v45 }
 0x196   :  { %2717 = vmatpush3.msra.mxu0 %v4168_v11  ;;  %2795 = vmatprep.subr.mxu1 %v3047_v0  ;;  %v3917_v11 = vand.u32 4294901760, %v1361_v56  ;;  %v1537_v28 = vand.u32 4294901760, %v3915_v10  ;;  %v1532_v46 = vand.u32 4294901760, %v1531_v21 }
 0x197   :  { %2718 = vmatprep.subr.mxu0 %v3047_v0  ;;  %v3949_v26 = vsub.f32 %v1359_v45, %v3938_v12 }
 0x198   :  { %2719 = vmatpush3.msra.mxu0 %v4169_v17  ;;  %v1360_v17 = vld [vmem:[#allocation5 + $0x118] sm:$0xff]  ;;  %v3927_v29 = vsub.f32 %v1361_v56, %v3917_v11  ;;  %v1538_v47 = vsub.f32 %v3915_v10, %v1537_v28 }
 0x199   :  { %2721 = vmatmul.mubr.f32.vlgmr.msra.gmra.mxu0 %v3632_v13  ;;  %2758 = vmatprep.subr.mxu0 %v3047_v0  ;;  %v1476_v13 = vand.u32 4294901760, %v1475_v15  ;;  %v3931_v34 = vand.u32 4294901760, %v1360_v17  ;;  %v4164_v3 = vand.u32 4294901760, %v3949_v26 }
 0x19a   :  { %2790 = vmatprep.mubr.msk.f32.mxu0 %vm3048_vm0, %v3047_v0  ;;  %2759 = vmatpush3.msra.mxu0 %v3799_v20  ;;  %v1544_v52 = vand.u32 4294901760, %v3927_v29  ;;  %v1539_v53 = vand.u32 4294901760, %v1538_v47 }
 0x19b   :  { %2760 = vmatprep.subr.mxu0 %v3047_v0  ;;  %2796 = vmatpush3.msra.mxu1 %v1476_v13  ;;  %v3942_v15 = vsub.f32 %v1360_v17, %v3931_v34  ;;  %v1559_v58 = vsub.f32 %v3949_v26, %v4164_v3 }
 0x19c   :  { %2761 = vmatpush3.msra.mxu0 %v3804_v27  ;;  %2797 = vmatprep.subr.mxu1 %v3047_v0  ;;  %v1545_v13 = vsub.f32 %v3927_v29, %v1544_v52 }
 0x19d   :  { %2762 = vmatprep.subr.mxu0 %v3047_v0  ;;  %2798 = vmatpush3.msra.mxu1 %v1483_v49  ;;  %v3951_v49 = vand.u32 4294901760, %v1358_v48  ;;  %v1560_v56 = vand.u32 4294901760, %v1559_v58 }
 0x19e   :  { %2763 = vmatpush3.msra.mxu0 %v3807_v35  ;;  %2799 = vmatprep.subr.mxu1 %v3047_v0 }
 0x19f   :  { %2764 = vmatprep.subr.mxu0 %v3047_v0  ;;  %2800 = vmatpush3.msra.mxu1 %v1490_v54  ;;  %v4165_v54 = vand.u32 4294901760, %v3942_v15  ;;  %v3959_v8 = vsub.f32 %v1358_v48, %v3951_v49 }
 0x1a0   :  { %2765 = vmatpush3.msra.mxu0 %v3809_v40  ;;  %2801 = vmatprep.subr.mxu1 %v3047_v0 }
 0x1a1   :  { %2766 = vmatprep.subr.mxu0 %v3047_v0  ;;  %2802 = vmatpush3.msra.mxu1 %v1497_v55  ;;  %v1546_v55 = vand.u32 4294901760, %v1545_v13  ;;  %v1552_v38 = vsub.f32 %v3942_v15, %v4165_v54 }
 0x1a2   :  { %2767 = vmatpush3.msra.mxu0 %v3811_v43  ;;  %2803 = vmatprep.subr.mxu1 %v3047_v0 }
 0x1a3   :  { %2768 = vmatprep.subr.mxu0 %v3047_v0  ;;  %2804 = vmatpush3.msra.mxu1 %v1504_v37  ;;  %v3961_v37 = vand.u32 4294901760, %v1357_v1 }
 0x1a4   :  { %2769 = vmatpush3.msra.mxu0 %v3819_v61  ;;  %2805 = vmatprep.subr.mxu1 %v3047_v0 }
 0x1a5   :  { %2770 = vmatprep.subr.mxu0 %v3047_v0  ;;  %2806 = vmatpush3.msra.mxu1 %v1511_v7  ;;  %v4163_v7 = vand.u32 4294901760, %v3959_v8  ;;  %v3974_v6 = vsub.f32 %v1357_v1, %v3961_v37 }
 0x1a6   :  { %2771 = vmatpush3.msra.mxu0 %v3821_v62  ;;  %2807 = vmatprep.subr.mxu1 %v3047_v0 }
 0x1a7   :  { %2772 = vmatprep.subr.mxu0 %v3047_v0  ;;  %2808 = vmatpush3.msra.mxu1 %v1518_v4  ;;  %v1553_v4 = vand.u32 4294901760, %v1552_v38  ;;  %v1566_v60 = vsub.f32 %v3959_v8, %v4163_v7  ;;  %v4162_v17 = vand.u32 4294901760, %v3974_v6 }
 0x1a8   :  { %2773 = vmatpush3.msra.mxu0 %v3833_v42  ;;  %2809 = vmatprep.subr.mxu1 %v3047_v0 }
 0x1a9   :  { %2774 = vmatprep.subr.mxu0 %v3047_v0  ;;  %2810 = vmatpush3.msra.mxu1 %v1525_v18  ;;  %v1567_v18 = vand.u32 4294901760, %v1566_v60  ;;  %v1573_v21 = vsub.f32 %v3974_v6, %v4162_v17 }
 0x1aa   :  { %2775 = vmatpush3.msra.mxu0 %v3888_v44  ;;  %2811 = vmatprep.subr.mxu1 %v3047_v0 }
 0x1ab   :  { %2776 = vmatprep.subr.mxu0 %v3047_v0  ;;  %2812 = vmatpush3.msra.mxu1 %v1532_v46  ;;  %v1574_v45 = vand.u32 4294901760, %v1573_v21 }
 0x1ac   :  { %2777 = vmatpush3.msra.mxu0 %v3896_v39  ;;  %2813 = vmatprep.subr.mxu1 %v3047_v0 }
 0x1ad   :  { %2778 = vmatprep.subr.mxu0 %v3047_v0  ;;  %2814 = vmatpush3.msra.mxu1 %v1539_v53 }
 0x1ae   :  { %2779 = vmatpush3.msra.mxu0 %v3905_v23  ;;  %2815 = vmatprep.subr.mxu1 %v3047_v0 }
 0x1af   :  { %2780 = vmatprep.subr.mxu0 %v3047_v0  ;;  %2816 = vmatpush3.msra.mxu1 %v1546_v55 }
 0x1b0   :  { %2781 = vmatpush3.msra.mxu0 %v3917_v11  ;;  %2817 = vmatprep.subr.mxu1 %v3047_v0 }
 0x1b1   :  { %2782 = vmatprep.subr.mxu0 %v3047_v0  ;;  %2818 = vmatpush3.msra.mxu1 %v1553_v4 }
 0x1b2   :  { %2783 = vmatpush3.msra.mxu0 %v3931_v34  ;;  %2819 = vmatprep.subr.mxu1 %v3047_v0 }
 0x1b3   :  { %2784 = vmatprep.subr.mxu0 %v3047_v0  ;;  %2820 = vmatpush3.msra.mxu1 %v1560_v56 }
 0x1b4   :  { %2785 = vmatpush3.msra.mxu0 %v3938_v12  ;;  %2821 = vmatprep.subr.mxu1 %v3047_v0 }
 0x1b5   :  { %2786 = vmatprep.subr.mxu0 %v3047_v0  ;;  %2822 = vmatpush3.msra.mxu1 %v1567_v18 }
 0x1b6   :  { %2787 = vmatpush3.msra.mxu0 %v3951_v49  ;;  %2823 = vmatprep.subr.mxu1 %v3047_v0 }
 0x1b7   :  { %2788 = vmatprep.subr.mxu0 %v3047_v0  ;;  %2824 = vmatpush3.msra.mxu1 %v1574_v45 }
 0x1b8   :  { %2789 = vmatpush3.msra.mxu0 %v3961_v37  ;;  %2863 = vmatprep.subr.mxu1 %v3047_v0 }
 0x1b9   :  { %2828 = vmatprep.subr.mxu0 %v3047_v0 }
 0x20f   :  { %v952_v46 = vpop.f32.mrf.mxu1 }
 0x211   :  { %v2617_v47 = vpop.f32.mrf.mxu1 }
 0x217   :  { %v801_v48 = vpop.f32.mrf.mxu0 }
 0x218   :  { %v953_v4 = vadd.f32 %v952_v46, %v801_v48 }
 0x219   :  { %v2582_v53 = vpop.f32.mrf.mxu0 }
 0x22f   :  { %v1145_v13 = vpop.f32.mrf.mxu1 }
 0x231   :  { %v2687_v1 = vpop.f32.mrf.mxu1 }
 0x238   :  { %v1056_v55 = vpop.f32.mrf.mxu0 }
 0x239   :  { %v1057_v60 = vadd.f32 %v1056_v55, %v953_v4 }
 0x23a   :  { %v2652_v38 = vpop.f32.mrf.mxu0 }
 0x23b   :  { %v1146_v17 = vadd.f32 %v1145_v13, %v1057_v60 }
 0x251   :  { %v1351_v58 = vpop.f32.mrf.mxu1 }
 0x253   :  { %v2757_v56 = vpop.f32.mrf.mxu1 }
 0x259   :  { %v1264_v21 = vpop.f32.mrf.mxu0 }
 0x25a   :  { %v1265_v18 = vadd.f32 %v1264_v21, %v1146_v17 }
 0x25b   :  { %v2722_v7 = vpop.f32.mrf.mxu0 }
 0x25c   :  { %v1352_v3 = vadd.f32 %v1351_v58, %v1265_v18 }
 0x25e   :  { %v1355_v45 = vmax.f32 %v1352_v3, 0.0 }
 0x260   :  { %v3991_v54 = vand.u32 4294901760, %v1355_v45 }
 0x262   :  { %v3994_v47 = vsub.f32 %v1355_v45, %v3991_v54  ;;  %2826 = vmatmul.mubr.f32.vlgmr.msra.gmra.mxu1 %v3991_v54 }
 0x263   :  { %2864 = vmatpush3.msra.mxu1 %v3799_v20  ;;  %2895 = vmatprep.mubr.msk.f32.mxu1 %vm3048_vm0, %v3047_v0 }
 0x264   :  { %v1456_v46 = vand.u32 4294901760, %v3994_v47  ;;  %2865 = vmatprep.subr.mxu1 %v3047_v0 }
 0x265   :  { %2866 = vmatpush3.msra.mxu1 %v3804_v27 }
 0x266   :  { %2867 = vmatprep.subr.mxu1 %v3047_v0  ;;  %v1457_v3 = vsub.f32 %v3994_v47, %v1456_v46 }
 0x267   :  { %2868 = vmatpush3.msra.mxu1 %v3807_v35 }
 0x268   :  { %2869 = vmatprep.subr.mxu1 %v3047_v0  ;;  %v1458_v7 = vand.u32 4294901760, %v1457_v3 }
 0x269   :  { %2870 = vmatpush3.msra.mxu1 %v3809_v40 }
 0x26a   :  { %2871 = vmatprep.subr.mxu1 %v3047_v0  ;;  %2791 = vmatmul.mubr.f32.vlgmr.msra.gmra.mxu0 %v1458_v7 }
 0x26b   :  { %2829 = vmatpush3.msra.mxu0 %v3802_v25  ;;  %2872 = vmatpush3.msra.mxu1 %v3811_v43  ;;  %v4171_v25 = vand.u32 4294901760, %v3949_v26 }
 0x26c   :  { %2830 = vmatprep.subr.mxu0 %v3047_v0  ;;  %2873 = vmatprep.subr.mxu1 %v3047_v0 }
 0x26d   :  { %2831 = vmatpush3.msra.mxu0 %v3816_v59  ;;  %2874 = vmatpush3.msra.mxu1 %v3819_v61 }
 0x26e   :  { %2832 = vmatprep.subr.mxu0 %v3047_v0  ;;  %2875 = vmatprep.subr.mxu1 %v3047_v0 }
 0x26f   :  { %2833 = vmatpush3.msra.mxu0 %v3824_v63  ;;  %2876 = vmatpush3.msra.mxu1 %v3821_v62 }
 0x270   :  { %2834 = vmatprep.subr.mxu0 %v3047_v0  ;;  %2877 = vmatprep.subr.mxu1 %v3047_v0 }
 0x271   :  { %2835 = vmatpush3.msra.mxu0 %v3827_v19  ;;  %2878 = vmatpush3.msra.mxu1 %v3833_v42 }
 0x272   :  { %2836 = vmatprep.subr.mxu0 %v3047_v0  ;;  %2879 = vmatprep.subr.mxu1 %v3047_v0 }
 0x273   :  { %2837 = vmatpush3.msra.mxu0 %v3830_v31  ;;  %2880 = vmatpush3.msra.mxu1 %v3888_v44 }
 0x274   :  { %2838 = vmatprep.subr.mxu0 %v3047_v0  ;;  %2881 = vmatprep.subr.mxu1 %v3047_v0 }
 0x275   :  { %2839 = vmatpush3.msra.mxu0 %v3840_v14  ;;  %2882 = vmatpush3.msra.mxu1 %v3896_v39 }
 0x276   :  { %2840 = vmatprep.subr.mxu0 %v3047_v0  ;;  %2883 = vmatprep.subr.mxu1 %v3047_v0 }
 0x277   :  { %2841 = vmatpush3.msra.mxu0 %v3844_v33  ;;  %2884 = vmatpush3.msra.mxu1 %v3905_v23 }
 0x278   :  { %2842 = vmatprep.subr.mxu0 %v3047_v0  ;;  %2885 = vmatprep.subr.mxu1 %v3047_v0 }
 0x279   :  { %2843 = vmatpush3.msra.mxu0 %v3856_v30  ;;  %2886 = vmatpush3.msra.mxu1 %v3917_v11 }
 0x27a   :  { %2844 = vmatprep.subr.mxu0 %v3047_v0  ;;  %2887 = vmatprep.subr.mxu1 %v3047_v0 }
 0x27b   :  { %2845 = vmatpush3.msra.mxu0 %v3894_v9  ;;  %2888 = vmatpush3.msra.mxu1 %v3931_v34 }
 0x27c   :  { %2846 = vmatprep.subr.mxu0 %v3047_v0  ;;  %2889 = vmatprep.subr.mxu1 %v3047_v0 }
 0x27d   :  { %2847 = vmatpush3.msra.mxu0 %v3903_v24  ;;  %2890 = vmatpush3.msra.mxu1 %v3938_v12 }
 0x27e   :  { %2848 = vmatprep.subr.mxu0 %v3047_v0  ;;  %2891 = vmatprep.subr.mxu1 %v3047_v0 }
 0x27f   :  { %2849 = vmatpush3.msra.mxu0 %v3915_v10  ;;  %2892 = vmatpush3.msra.mxu1 %v3951_v49 }
 0x280   :  { %2850 = vmatprep.subr.mxu0 %v3047_v0  ;;  %2893 = vmatprep.subr.mxu1 %v3047_v0 }
 0x281   :  { %2851 = vmatpush3.msra.mxu0 %v3927_v29  ;;  %2894 = vmatpush3.msra.mxu1 %v3961_v37 }
 0x282   :  { %2852 = vmatprep.subr.mxu0 %v3047_v0  ;;  %2896 = vmatmul.mubr.f32.vlgmr.msra.gmra.mxu1 %v1456_v46 }
 0x283   :  { %2933 = vmatprep.subr.mxu1 %v3047_v0  ;;  %2853 = vmatpush3.msra.mxu0 %v3942_v15 }
 0x284   :  { %2934 = vmatpush3.msra.mxu1 %v3799_v20  ;;  %2854 = vmatprep.subr.mxu0 %v3047_v0  ;;  %v4170_v20 = vand.u32 4294901760, %v3942_v15 }
 0x285   :  { %2935 = vmatprep.subr.mxu1 %v3047_v0  ;;  %2855 = vmatpush3.msra.mxu0 %v3949_v26 }
 0x286   :  { %2936 = vmatpush3.msra.mxu1 %v3804_v27  ;;  %2856 = vmatprep.subr.mxu0 %v3047_v0  ;;  %v4172_v27 = vand.u32 4294901760, %v3959_v8 }
 0x287   :  { %2937 = vmatprep.subr.mxu1 %v3047_v0  ;;  %2857 = vmatpush3.msra.mxu0 %v3959_v8 }
 0x288   :  { %2938 = vmatpush3.msra.mxu1 %v3807_v35  ;;  %2858 = vmatprep.subr.mxu0 %v3047_v0  ;;  %v4173_v35 = vand.u32 4294901760, %v3974_v6 }
 0x289   :  { %2939 = vmatprep.subr.mxu1 %v3047_v0  ;;  %2859 = vmatpush3.msra.mxu0 %v3974_v6 }
 0x28a   :  { %2860 = vmatprep.mubr.msk.f32.mxu0 %vm3048_vm0, %v3047_v0  ;;  %2940 = vmatpush3.msra.mxu1 %v3809_v40 }
 0x28b   :  { %2861 = vmatmul.mubr.f32.vlgmr.msra.gmra.mxu0 %v3994_v47  ;;  %2898 = vmatprep.subr.mxu0 %v3047_v0 }
 0x28c   :  { %2941 = vmatprep.subr.mxu1 %v3047_v0  ;;  %2899 = vmatpush3.msra.mxu0 %v1467_v57 }
 0x28d   :  { %2942 = vmatpush3.msra.mxu1 %v3811_v43  ;;  %2900 = vmatprep.subr.mxu0 %v3047_v0 }
 0x28e   :  { %2943 = vmatprep.subr.mxu1 %v3047_v0  ;;  %2901 = vmatpush3.msra.mxu0 %v1474_v2 }
 0x28f   :  { %2944 = vmatpush3.msra.mxu1 %v3819_v61  ;;  %2902 = vmatprep.subr.mxu0 %v3047_v0 }
 0x290   :  { %2945 = vmatprep.subr.mxu1 %v3047_v0  ;;  %2903 = vmatpush3.msra.mxu0 %v1481_v41 }
 0x291   :  { %2946 = vmatpush3.msra.mxu1 %v3821_v62  ;;  %2904 = vmatprep.subr.mxu0 %v3047_v0 }
 0x292   :  { %2947 = vmatprep.subr.mxu1 %v3047_v0  ;;  %2905 = vmatpush3.msra.mxu0 %v1488_v50 }
 0x293   :  { %2948 = vmatpush3.msra.mxu1 %v3833_v42  ;;  %2906 = vmatprep.subr.mxu0 %v3047_v0 }
 0x294   :  { %2949 = vmatprep.subr.mxu1 %v3047_v0  ;;  %2907 = vmatpush3.msra.mxu0 %v1495_v51 }
 0x295   :  { %2950 = vmatpush3.msra.mxu1 %v3888_v44  ;;  %2908 = vmatprep.subr.mxu0 %v3047_v0 }
 0x296   :  { %2951 = vmatprep.subr.mxu1 %v3047_v0  ;;  %2909 = vmatpush3.msra.mxu0 %v1502_v16 }
 0x297   :  { %2952 = vmatpush3.msra.mxu1 %v3896_v39  ;;  %2910 = vmatprep.subr.mxu0 %v3047_v0 }
 0x298   :  { %2953 = vmatprep.subr.mxu1 %v3047_v0  ;;  %2911 = vmatpush3.msra.mxu0 %v1509_v32 }
 0x299   :  { %2954 = vmatpush3.msra.mxu1 %v3905_v23  ;;  %2912 = vmatprep.subr.mxu0 %v3047_v0 }
 0x29a   :  { %2955 = vmatprep.subr.mxu1 %v3047_v0  ;;  %2913 = vmatpush3.msra.mxu0 %v1516_v36 }
 0x29b   :  { %2956 = vmatpush3.msra.mxu1 %v3917_v11  ;;  %2914 = vmatprep.subr.mxu0 %v3047_v0 }
 0x29c   :  { %2957 = vmatprep.subr.mxu1 %v3047_v0  ;;  %2915 = vmatpush3.msra.mxu0 %v1523_v22 }
 0x29d   :  { %2958 = vmatpush3.msra.mxu1 %v3931_v34  ;;  %2916 = vmatprep.subr.mxu0 %v3047_v0 }
 0x29e   :  { %2959 = vmatprep.subr.mxu1 %v3047_v0  ;;  %2917 = vmatpush3.msra.mxu0 %v1530_v5 }
 0x29f   :  { %2960 = vmatpush3.msra.mxu1 %v3938_v12  ;;  %2918 = vmatprep.subr.mxu0 %v3047_v0 }
 0x2a0   :  { %2961 = vmatprep.subr.mxu1 %v3047_v0  ;;  %2919 = vmatpush3.msra.mxu0 %v1537_v28 }
 0x2a1   :  { %2962 = vmatpush3.msra.mxu1 %v3951_v49  ;;  %2920 = vmatprep.subr.mxu0 %v3047_v0 }
 0x2a2   :  { %2963 = vmatprep.subr.mxu1 %v3047_v0  ;;  %2921 = vmatpush3.msra.mxu0 %v1544_v52 }
 0x2a3   :  { %2964 = vmatpush3.msra.mxu1 %v3961_v37  ;;  %2965 = vmatprep.mubr.msk.f32.mxu1 %vm3048_vm0, %v3047_v0 }
 0x2a4   :  { %2922 = vmatprep.subr.mxu0 %v3047_v0  ;;  %2966 = vmatmul.mubr.f32.vlgmr.msra.gmra.mxu1 %v3991_v54 }
 0x2a5   :  { %2923 = vmatpush3.msra.mxu0 %v4170_v20  ;;  %2930 = vmatprep.mubr.msk.f32.mxu0 %vm3048_vm0, %v3047_v0 }
 0x2a6   :  { %2924 = vmatprep.subr.mxu0 %v3047_v0 }
 0x2a7   :  { %2925 = vmatpush3.msra.mxu0 %v4171_v25 }
 0x2a8   :  { %2926 = vmatprep.subr.mxu0 %v3047_v0 }
 0x2a9   :  { %2927 = vmatpush3.msra.mxu0 %v4172_v27 }
 0x2aa   :  { %2928 = vmatprep.subr.mxu0 %v3047_v0 }
 0x2ab   :  { %2929 = vmatpush3.msra.mxu0 %v4173_v35 }
 0x2ac   :  { %2931 = vmatmul.mubr.f32.vlgmr.msra.gmra.mxu0 %v3991_v54 }
 0x322   :  { %v1611_v40 = vpop.f32.mrf.mxu1 }
 0x324   :  { %v2827_v43 = vpop.f32.mrf.mxu1 }
 0x32a   :  { %v1460_v57 = vpop.f32.mrf.mxu0 }
 0x32b   :  { %v1612_v42 = vadd.f32 %v1611_v40, %v1460_v57 }
 0x32c   :  { %v2792_v59 = vpop.f32.mrf.mxu0 }
 0x342   :  { %v1804_v61 = vpop.f32.mrf.mxu1 }
 0x344   :  { %v2897_v62 = vpop.f32.mrf.mxu1 }
 0x34b   :  { %v1715_v63 = vpop.f32.mrf.mxu0 }
 0x34c   :  { %v1716_v14 = vadd.f32 %v1715_v63, %v1612_v42 }
 0x34d   :  { %v2862_v19 = vpop.f32.mrf.mxu0 }
 0x34e   :  { %v1805_v33 = vadd.f32 %v1804_v61, %v1716_v14 }
 0x364   :  { %v2010_v31 = vpop.f32.mrf.mxu1 }
 0x366   :  { %v2967_v2 = vpop.f32.mrf.mxu1 }
 0x36c   :  { %v1923_v41 = vpop.f32.mrf.mxu0 }
 0x36d   :  { %v1924_v0 = vadd.f32 %v1923_v41, %v1805_v33 }
 0x36e   :  { %v2932_v50 = vpop.f32.mrf.mxu0 }
 0x36f   :  { %v2011_v51 = vadd.f32 %v2010_v31, %v1924_v0 }
 0x371   :  { %2975 = vtanh.f32 %v2011_v51 }
 0x37e   :  { %v2976_v16 = vpop.eup %2975 }
 0x37f   :  { %2015 = vst [vmem:[#allocation7] sm:$0xff] %v2976_v16 }
 0x380   :  { %3028 = shalt.err (!%p3025_p0)
}
 0x381   :  { %2025 = dma.vmem_to_hbm [thread:$0]  %s2023_s1, 128, %s4157_s2, [#allocation4]  }
 0x382   :  { %3041 = dma.done.wait [#allocation4], 128  }
 0x383   :  { %3042 = vsyncadd [#allocation4], 4294967168 }
 0x384   :  { %2029 = vsyncpa [#allocation3], 1 }
 0x385   :  { %2030 = vsyncpa [#allocation6], 1 }
 0x386   :  { %2031 = vsyncpa [#allocation4], 1 }

</bundles_post_ra>
